<compile_context>
chip_gen: v7x
topology: tpu7x:2x2x1
jax: 0.10.0
libtpu: 0.0.40
codegen_flags: <defaults>
</compile_context>

<pallas_src>
import functools

import jax
import jax.numpy as jnp
from jax.experimental import pallas as pl
from jax.experimental.pallas import tpu as pltpu


def _lstm_fc_kernel(n_layers, seq_len, batch, hidden_dim, *refs):
    """refs = (x0, h0, c0, [w_ih, w_hh, b] * n_layers, fc_w, fc_b,
               out, h_n, c_n, hs_scratch)

    Layouts:
      x0         : (T*B, E)      bfloat16, row = t*B + b
      h0, c0     : (L, B, H)     float32
      w_ih       : (in_dim, 4H)  bfloat16, gate columns ordered (i, f, o, g)
      w_hh       : (H, 4H)       bfloat16, gate columns ordered (i, f, o, g)
      b          : (1, 4H)       float32  (= b_ih + b_hh, reordered)
      fc_w       : (H, out)      float32
      fc_b       : (1, out)      float32
      hs_scratch : (T*B, H)      float32 VMEM scratch (hidden seq of non-final layers)
    """
    H = hidden_dim
    T = seq_len
    B = batch

    x0_ref, h0_ref, c0_ref = refs[0], refs[1], refs[2]
    layer_refs = refs[3:3 + 3 * n_layers]
    fc_w_ref, fc_b_ref = refs[3 + 3 * n_layers], refs[4 + 3 * n_layers]
    out_ref, hn_ref, cn_ref = refs[5 + 3 * n_layers:8 + 3 * n_layers]
    hs_ref = refs[8 + 3 * n_layers]

    h = None
    for layer in range(n_layers):
        w_ih = layer_refs[3 * layer][...]      # (in_dim, 4H) bf16
        w_hh = layer_refs[3 * layer + 1][...]  # (H, 4H)      bf16
        b = layer_refs[3 * layer + 2][...]     # (1, 4H)      f32

        if layer == 0:
            x = x0_ref[...]                         # (T*B, E) bf16
        else:
            x = hs_ref[...].astype(jnp.bfloat16)    # (T*B, H) bf16

        # Hoisted input projection: one matmul for ALL timesteps, bias fused once.
        xproj = jnp.dot(x, w_ih, preferred_element_type=jnp.float32) + b  # (T*B, 4H) f32

        h = h0_ref[layer]                   # (B, H) f32
        c = c0_ref[layer]                   # (B, H) f32
        h_b = h.astype(jnp.bfloat16)
        last_layer = layer == n_layers - 1

        for t in range(T):  # small static unroll; the recurrence is inherently serial
            # Serial critical path per step: one bf16 MXU matmul + elementwise update.
            gates = xproj[t * B:(t + 1) * B, :] + jnp.dot(
                h_b, w_hh, preferred_element_type=jnp.float32)           # (B, 4H)
            sig = jax.nn.sigmoid(gates[:, 0:3 * H])   # one wide EUP op over (i|f|o)
            g_g = jnp.tanh(gates[:, 3 * H:4 * H])
            i_g = sig[:, 0:H]
            f_g = sig[:, H:2 * H]
            o_g = sig[:, 2 * H:3 * H]
            c = f_g * c + i_g * g_g
            h = o_g * jnp.tanh(c)
            h_b = h.astype(jnp.bfloat16)
            if not last_layer:
                hs_ref[pl.ds(t * B, B), :] = h       # cheap vst; no jnp.stack

        hn_ref[layer] = h
        cn_ref[layer] = c

    # fc on final hidden state of the top layer == fc(lstm_out)[:, -1]
    out_ref[...] = (jnp.dot(h, fc_w_ref[...], preferred_element_type=jnp.float32)
                    + fc_b_ref[...])


def _permute_gates(w, H):
    """PyTorch gate block order (i, f, g, o) -> kernel order (i, f, o, g) along axis 0."""
    i, f, g, o = w[0 * H:1 * H], w[1 * H:2 * H], w[2 * H:3 * H], w[3 * H:4 * H]
    return jnp.concatenate([i, f, o, g], axis=0)


def prepare_params(params, n_layers, hidden_dim):
    """One-time weight prep (transpose, bias fusion, gate reorder, bf16 cast)."""
    H = hidden_dim
    prep = {
        "embed": params["embed"],                        # (V, E) f32
        "fc_w_t": jnp.transpose(params["fc_w"]),         # (H, out) f32
        "fc_b": params["fc_b"][None, :],                 # (1, out) f32
    }
    for l in range(n_layers):
        w_ih = _permute_gates(params[f"w_ih_l{l}"], H)                   # (4H, in)
        w_hh = _permute_gates(params[f"w_hh_l{l}"], H)                   # (4H, H)
        b = _permute_gates(params[f"b_ih_l{l}"] + params[f"b_hh_l{l}"], H)  # (4H,)
        prep[f"w_ih_t_l{l}"] = jnp.transpose(w_ih).astype(jnp.bfloat16)  # (in, 4H)
        prep[f"w_hh_t_l{l}"] = jnp.transpose(w_hh).astype(jnp.bfloat16)  # (H, 4H)
        prep[f"b_l{l}"] = b[None, :]                                     # (1, 4H) f32
    return prep


@jax.jit
def rnn_forward(prep, nn_input, hidden):
    """Pallas implementation of RNN.forward: returns (out[:, -1], (h_n, c_n))."""
    h0, c0 = hidden
    B, T = nn_input.shape
    n_layers, _, H = h0.shape
    out_size = prep["fc_b"].shape[-1]
    E = prep["embed"].shape[-1]

    # Embedding gather (data-dependent) stays in XLA glue. Rows arranged as t*B + b so
    # each timestep is a contiguous sublane block inside the kernel (no in-kernel reshape).
    ids_tb = jnp.transpose(nn_input.astype(jnp.int32))    # (T, B)
    embeds = jnp.take(prep["embed"], ids_tb, axis=0)      # (T, B, E)
    x0 = embeds.reshape(T * B, E).astype(jnp.bfloat16)

    inputs = [x0, h0, c0]
    for l in range(n_layers):
        inputs += [prep[f"w_ih_t_l{l}"], prep[f"w_hh_t_l{l}"], prep[f"b_l{l}"]]
    inputs += [prep["fc_w_t"], prep["fc_b"]]

    kernel = functools.partial(_lstm_fc_kernel, n_layers, T, B, H)
    out_shapes = (
        jax.ShapeDtypeStruct((B, out_size), jnp.float32),
        jax.ShapeDtypeStruct((n_layers, B, H), jnp.float32),
        jax.ShapeDtypeStruct((n_layers, B, H), jnp.float32),
    )
    vmem = pl.BlockSpec(memory_space=pltpu.MemorySpace.VMEM)
    out, h_n, c_n = pl.pallas_call(
        kernel,
        out_shape=out_shapes,
        in_specs=[vmem] * len(inputs),
        out_specs=(vmem, vmem, vmem),
        scratch_shapes=[pltpu.VMEM((T * B, H), jnp.float32)],
    )(*inputs)
    # TODO(synk): for non-toy batch sizes on v7x, add a grid over the batch axis with
    #             dimension_semantics=("parallel",) so both TensorCores are used.
    return out, (h_n, c_n)


def rnn_forward_ref(params, nn_input, hidden):
    """Pure-JAX f32 reference (PyTorch eval semantics) for correctness checking."""
    embed_w = params["embed"]
    h0, c0 = hidden
    B, T = nn_input.shape
    n_layers, _, H = h0.shape
    x = jnp.take(embed_w, nn_input.astype(jnp.int32), axis=0)
    hn, cn = [], []
    for l in range(n_layers):
        w_ih = params[f"w_ih_l{l}"]
        w_hh = params[f"w_hh_l{l}"]
        b = params[f"b_ih_l{l}"] + params[f"b_hh_l{l}"]
        h, c = h0[l], c0[l]
        hs = []
        for t in range(T):
            g = x[:, t, :] @ w_ih.T + h @ w_hh.T + b
            i_g = jax.nn.sigmoid(g[:, 0 * H:1 * H])
            f_g = jax.nn.sigmoid(g[:, 1 * H:2 * H])
            g_g = jnp.tanh(g[:, 2 * H:3 * H])
            o_g = jax.nn.sigmoid(g[:, 3 * H:4 * H])
            c = f_g * c + i_g * g_g
            h = o_g * jnp.tanh(c)
            hs.append(h)
        hn.append(h)
        cn.append(c)
        x = jnp.stack(hs, axis=1)
    out = x[:, -1, :] @ params["fc_w"].T + params["fc_b"]
    return out, (jnp.stack(hn), jnp.stack(cn))


def init_params(key, vocab_size, output_size, embedding_dim, hidden_dim, n_layers):
    """Deterministic synthetic init mirroring PyTorch shapes/init ranges."""
    params = {}
    keys = jax.random.split(key, 2 + 4 * n_layers + 2)
    k_iter = iter(keys)
    params["embed"] = jax.random.normal(next(k_iter), (vocab_size, embedding_dim),
                                        jnp.float32)
    stdv = 1.0 / jnp.sqrt(hidden_dim)
    for l in range(n_layers):
        in_dim = embedding_dim if l == 0 else hidden_dim
        params[f"w_ih_l{l}"] = jax.random.uniform(
            next(k_iter), (4 * hidden_dim, in_dim), jnp.float32, -stdv, stdv)
        params[f"w_hh_l{l}"] = jax.random.uniform(
            next(k_iter), (4 * hidden_dim, hidden_dim), jnp.float32, -stdv, stdv)
        params[f"b_ih_l{l}"] = jax.random.uniform(
            next(k_iter), (4 * hidden_dim,), jnp.float32, -stdv, stdv)
        params[f"b_hh_l{l}"] = jax.random.uniform(
            next(k_iter), (4 * hidden_dim,), jnp.float32, -stdv, stdv)
    fstdv = 1.0 / jnp.sqrt(hidden_dim)
    params["fc_w"] = jax.random.uniform(
        next(k_iter), (output_size, hidden_dim), jnp.float32, -fstdv, fstdv)
    params["fc_b"] = jax.random.uniform(
        next(k_iter), (output_size,), jnp.float32, -fstdv, fstdv)
    return params


if __name__ == "__main__":
    vocab_size = 100
    output_size = 16
    embedding_dim = 32
    hidden_dim = 32
    n_layers = 2
    B, T = 2, 8

    root = jax.random.PRNGKey(0)
    k_params, k_input = jax.random.split(root)

    params = init_params(k_params, vocab_size, output_size, embedding_dim,
                         hidden_dim, n_layers)
    nn_input = jax.random.randint(k_input, (B, T), 0, vocab_size, dtype=jnp.int32)
    hidden = (jnp.zeros((n_layers, B, hidden_dim), jnp.float32),
              jnp.zeros((n_layers, B, hidden_dim), jnp.float32))

    # One-time param prep (transposes, bias fusion, gate reorder, bf16 cast).
    prep = prepare_params(params, n_layers, hidden_dim)

    out, (h_n, c_n) = rnn_forward(prep, nn_input, hidden)
    jax.block_until_ready((out, h_n, c_n))

    out_ref, (h_ref, c_ref) = rnn_forward_ref(params, nn_input, hidden)
    assert out.shape == (B, output_size)
    assert h_n.shape == (n_layers, B, hidden_dim)
    assert c_n.shape == (n_layers, B, hidden_dim)
    # bf16 MXU inputs in the recurrence => looser tolerance vs the f32 reference.
    assert jnp.allclose(out, out_ref, atol=3e-2, rtol=3e-2)
    assert jnp.allclose(h_n, h_ref, atol=3e-2, rtol=3e-2)
    assert jnp.allclose(c_n, c_ref, atol=3e-2, rtol=3e-2)

    print("KERNEL_OK")
</pallas_src>

<mosaic_0001>
module attributes {stable_mosaic.version = 11 : i64} {
  func.func @_lstm_fc_kernel(%arg0: memref<16x32xbf16, #tpu.memory_space<vmem>>, %arg1: memref<2x2x32xf32, #tpu.memory_space<vmem>>, %arg2: memref<2x2x32xf32, #tpu.memory_space<vmem>>, %arg3: memref<32x128xbf16, #tpu.memory_space<vmem>>, %arg4: memref<32x128xbf16, #tpu.memory_space<vmem>>, %arg5: memref<1x128xf32, #tpu.memory_space<vmem>>, %arg6: memref<32x128xbf16, #tpu.memory_space<vmem>>, %arg7: memref<32x128xbf16, #tpu.memory_space<vmem>>, %arg8: memref<1x128xf32, #tpu.memory_space<vmem>>, %arg9: memref<32x16xf32, #tpu.memory_space<vmem>>, %arg10: memref<1x16xf32, #tpu.memory_space<vmem>>, %arg11: memref<2x16xf32, #tpu.memory_space<vmem>>, %arg12: memref<2x2x32xf32, #tpu.memory_space<vmem>>, %arg13: memref<2x2x32xf32, #tpu.memory_space<vmem>>, %arg14: memref<16x32xf32, #tpu.memory_space<vmem>>) attributes {dimension_semantics = [], scalar_prefetch = 0 : i64, scratch_operands = 1 : i64, tpu.core_type = #tpu.core_type<tc>} {
    %c0 = arith.constant 0 : index
    %c0_0 = arith.constant 0 : index
    %0 = vector.load %arg3[%c0, %c0_0] : memref<32x128xbf16, #tpu.memory_space<vmem>>, vector<32x128xbf16>
    %c0_1 = arith.constant 0 : index
    %c0_2 = arith.constant 0 : index
    %1 = vector.load %arg4[%c0_1, %c0_2] : memref<32x128xbf16, #tpu.memory_space<vmem>>, vector<32x128xbf16>
    %c0_3 = arith.constant 0 : index
    %c0_4 = arith.constant 0 : index
    %2 = vector.load %arg5[%c0_3, %c0_4] : memref<1x128xf32, #tpu.memory_space<vmem>>, vector<1x128xf32>
    %c0_5 = arith.constant 0 : index
    %c0_6 = arith.constant 0 : index
    %3 = vector.load %arg0[%c0_5, %c0_6] : memref<16x32xbf16, #tpu.memory_space<vmem>>, vector<16x32xbf16>
    %cst = arith.constant dense<0.000000e+00> : vector<16x128xf32>
    %4 = tpu.matmul %3, %0, %cst {dimension_numbers = #tpu.dot_dimension_numbers<[1], [0], [0], [1], [0, 0, 1, 1], [], []>} : vector<16x32xbf16>, vector<32x128xbf16>, vector<16x128xf32> -> vector<16x128xf32>
    %5 = vector.broadcast %2 : vector<1x128xf32> to vector<16x128xf32>
    %6 = arith.addf %4, %5 : vector<16x128xf32>
    %c0_7 = arith.constant 0 : index
    %c0_8 = arith.constant 0 : index
    %c0_9 = arith.constant 0 : index
    %7 = vector.load %arg1[%c0_7, %c0_8, %c0_9] : memref<2x2x32xf32, #tpu.memory_space<vmem>>, vector<1x2x32xf32>
    %8 = vector.shape_cast %7 : vector<1x2x32xf32> to vector<2x32xf32>
    %c0_10 = arith.constant 0 : index
    %c0_11 = arith.constant 0 : index
    %c0_12 = arith.constant 0 : index
    %9 = vector.load %arg2[%c0_10, %c0_11, %c0_12] : memref<2x2x32xf32, #tpu.memory_space<vmem>>, vector<1x2x32xf32>
    %10 = vector.shape_cast %9 : vector<1x2x32xf32> to vector<2x32xf32>
    %11 = arith.truncf %8 : vector<2x32xf32> to vector<2x32xbf16>
    %12 = vector.extract_strided_slice %6 {offsets = [0, 0], sizes = [2, 128], strides = [1, 1]} : vector<16x128xf32> to vector<2x128xf32>
    %cst_13 = arith.constant dense<0.000000e+00> : vector<2x128xf32>
    %13 = tpu.matmul %11, %1, %cst_13 {dimension_numbers = #tpu.dot_dimension_numbers<[1], [0], [0], [1], [0, 0, 1, 1], [], []>} : vector<2x32xbf16>, vector<32x128xbf16>, vector<2x128xf32> -> vector<2x128xf32>
    %14 = arith.addf %12, %13 : vector<2x128xf32>
    %15 = vector.extract_strided_slice %14 {offsets = [0, 0], sizes = [2, 96], strides = [1, 1]} : vector<2x128xf32> to vector<2x96xf32>
    %16 = arith.negf %15 : vector<2x96xf32>
    %17 = math.exp %16 : vector<2x96xf32>
    %cst_14 = arith.constant 1.000000e+00 : f32
    %18 = vector.broadcast %cst_14 : f32 to vector<2x96xf32>
    %19 = arith.addf %18, %17 : vector<2x96xf32>
    %20 = arith.divf %18, %19 : vector<2x96xf32>
    %21 = vector.extract_strided_slice %14 {offsets = [0, 96], sizes = [2, 32], strides = [1, 1]} : vector<2x128xf32> to vector<2x32xf32>
    %22 = math.tanh %21 : vector<2x32xf32>
    %23 = vector.extract_strided_slice %20 {offsets = [0, 0], sizes = [2, 32], strides = [1, 1]} : vector<2x96xf32> to vector<2x32xf32>
    %24 = vector.extract_strided_slice %20 {offsets = [0, 32], sizes = [2, 32], strides = [1, 1]} : vector<2x96xf32> to vector<2x32xf32>
    %25 = vector.extract_strided_slice %20 {offsets = [0, 64], sizes = [2, 32], strides = [1, 1]} : vector<2x96xf32> to vector<2x32xf32>
    %26 = arith.mulf %24, %10 : vector<2x32xf32>
    %27 = arith.mulf %23, %22 : vector<2x32xf32>
    %28 = arith.addf %26, %27 : vector<2x32xf32>
    %29 = math.tanh %28 : vector<2x32xf32>
    %30 = arith.mulf %25, %29 : vector<2x32xf32>
    %31 = arith.truncf %30 : vector<2x32xf32> to vector<2x32xbf16>
    %c0_15 = arith.constant 0 : index
    %c0_16 = arith.constant 0 : index
    %32 = vector.load %arg14[%c0_15, %c0_16] : memref<16x32xf32, #tpu.memory_space<vmem>>, vector<2x32xf32>
    tpu.vector_store %arg14[%c0_15, %c0_16], %30 {strides = array<i32>} : memref<16x32xf32, #tpu.memory_space<vmem>>, vector<2x32xf32>,
    %33 = vector.extract_strided_slice %6 {offsets = [2, 0], sizes = [2, 128], strides = [1, 1]} : vector<16x128xf32> to vector<2x128xf32>
    %cst_17 = arith.constant dense<0.000000e+00> : vector<2x128xf32>
    %34 = tpu.matmul %31, %1, %cst_17 {dimension_numbers = #tpu.dot_dimension_numbers<[1], [0], [0], [1], [0, 0, 1, 1], [], []>} : vector<2x32xbf16>, vector<32x128xbf16>, vector<2x128xf32> -> vector<2x128xf32>
    %35 = arith.addf %33, %34 : vector<2x128xf32>
    %36 = vector.extract_strided_slice %35 {offsets = [0, 0], sizes = [2, 96], strides = [1, 1]} : vector<2x128xf32> to vector<2x96xf32>
    %37 = arith.negf %36 : vector<2x96xf32>
    %38 = math.exp %37 : vector<2x96xf32>
    %cst_18 = arith.constant 1.000000e+00 : f32
    %39 = vector.broadcast %cst_18 : f32 to vector<2x96xf32>
    %40 = arith.addf %39, %38 : vector<2x96xf32>
    %41 = arith.divf %39, %40 : vector<2x96xf32>
    %42 = vector.extract_strided_slice %35 {offsets = [0, 96], sizes = [2, 32], strides = [1, 1]} : vector<2x128xf32> to vector<2x32xf32>
    %43 = math.tanh %42 : vector<2x32xf32>
    %44 = vector.extract_strided_slice %41 {offsets = [0, 0], sizes = [2, 32], strides = [1, 1]} : vector<2x96xf32> to vector<2x32xf32>
    %45 = vector.extract_strided_slice %41 {offsets = [0, 32], sizes = [2, 32], strides = [1, 1]} : vector<2x96xf32> to vector<2x32xf32>
    %46 = vector.extract_strided_slice %41 {offsets = [0, 64], sizes = [2, 32], strides = [1, 1]} : vector<2x96xf32> to vector<2x32xf32>
    %47 = arith.mulf %45, %28 : vector<2x32xf32>
    %48 = arith.mulf %44, %43 : vector<2x32xf32>
    %49 = arith.addf %47, %48 : vector<2x32xf32>
    %50 = math.tanh %49 : vector<2x32xf32>
    %51 = arith.mulf %46, %50 : vector<2x32xf32>
    %52 = arith.truncf %51 : vector<2x32xf32> to vector<2x32xbf16>
    %c2 = arith.constant 2 : index
    %c0_19 = arith.constant 0 : index
    %53 = vector.load %arg14[%c2, %c0_19] : memref<16x32xf32, #tpu.memory_space<vmem>>, vector<2x32xf32>
    tpu.vector_store %arg14[%c2, %c0_19], %51 {strides = array<i32>} : memref<16x32xf32, #tpu.memory_space<vmem>>, vector<2x32xf32>,
    %54 = vector.extract_strided_slice %6 {offsets = [4, 0], sizes = [2, 128], strides = [1, 1]} : vector<16x128xf32> to vector<2x128xf32>
    %cst_20 = arith.constant dense<0.000000e+00> : vector<2x128xf32>
    %55 = tpu.matmul %52, %1, %cst_20 {dimension_numbers = #tpu.dot_dimension_numbers<[1], [0], [0], [1], [0, 0, 1, 1], [], []>} : vector<2x32xbf16>, vector<32x128xbf16>, vector<2x128xf32> -> vector<2x128xf32>
    %56 = arith.addf %54, %55 : vector<2x128xf32>
    %57 = vector.extract_strided_slice %56 {offsets = [0, 0], sizes = [2, 96], strides = [1, 1]} : vector<2x128xf32> to vector<2x96xf32>
    %58 = arith.negf %57 : vector<2x96xf32>
    %59 = math.exp %58 : vector<2x96xf32>
    %cst_21 = arith.constant 1.000000e+00 : f32
    %60 = vector.broadcast %cst_21 : f32 to vector<2x96xf32>
    %61 = arith.addf %60, %59 : vector<2x96xf32>
    %62 = arith.divf %60, %61 : vector<2x96xf32>
    %63 = vector.extract_strided_slice %56 {offsets = [0, 96], sizes = [2, 32], strides = [1, 1]} : vector<2x128xf32> to vector<2x32xf32>
    %64 = math.tanh %63 : vector<2x32xf32>
    %65 = vector.extract_strided_slice %62 {offsets = [0, 0], sizes = [2, 32], strides = [1, 1]} : vector<2x96xf32> to vector<2x32xf32>
    %66 = vector.extract_strided_slice %62 {offsets = [0, 32], sizes = [2, 32], strides = [1, 1]} : vector<2x96xf32> to vector<2x32xf32>
    %67 = vector.extract_strided_slice %62 {offsets = [0, 64], sizes = [2, 32], strides = [1, 1]} : vector<2x96xf32> to vector<2x32xf32>
    %68 = arith.mulf %66, %49 : vector<2x32xf32>
    %69 = arith.mulf %65, %64 : vector<2x32xf32>
    %70 = arith.addf %68, %69 : vector<2x32xf32>
    %71 = math.tanh %70 : vector<2x32xf32>
    %72 = arith.mulf %67, %71 : vector<2x32xf32>
    %73 = arith.truncf %72 : vector<2x32xf32> to vector<2x32xbf16>
    %c4 = arith.constant 4 : index
    %c0_22 = arith.constant 0 : index
    %74 = vector.load %arg14[%c4, %c0_22] : memref<16x32xf32, #tpu.memory_space<vmem>>, vector<2x32xf32>
    tpu.vector_store %arg14[%c4, %c0_22], %72 {strides = array<i32>} : memref<16x32xf32, #tpu.memory_space<vmem>>, vector<2x32xf32>,
    %75 = vector.extract_strided_slice %6 {offsets = [6, 0], sizes = [2, 128], strides = [1, 1]} : vector<16x128xf32> to vector<2x128xf32>
    %cst_23 = arith.constant dense<0.000000e+00> : vector<2x128xf32>
    %76 = tpu.matmul %73, %1, %cst_23 {dimension_numbers = #tpu.dot_dimension_numbers<[1], [0], [0], [1], [0, 0, 1, 1], [], []>} : vector<2x32xbf16>, vector<32x128xbf16>, vector<2x128xf32> -> vector<2x128xf32>
    %77 = arith.addf %75, %76 : vector<2x128xf32>
    %78 = vector.extract_strided_slice %77 {offsets = [0, 0], sizes = [2, 96], strides = [1, 1]} : vector<2x128xf32> to vector<2x96xf32>
    %79 = arith.negf %78 : vector<2x96xf32>
    %80 = math.exp %79 : vector<2x96xf32>
    %cst_24 = arith.constant 1.000000e+00 : f32
    %81 = vector.broadcast %cst_24 : f32 to vector<2x96xf32>
    %82 = arith.addf %81, %80 : vector<2x96xf32>
    %83 = arith.divf %81, %82 : vector<2x96xf32>
    %84 = vector.extract_strided_slice %77 {offsets = [0, 96], sizes = [2, 32], strides = [1, 1]} : vector<2x128xf32> to vector<2x32xf32>
    %85 = math.tanh %84 : vector<2x32xf32>
    %86 = vector.extract_strided_slice %83 {offsets = [0, 0], sizes = [2, 32], strides = [1, 1]} : vector<2x96xf32> to vector<2x32xf32>
    %87 = vector.extract_strided_slice %83 {offsets = [0, 32], sizes = [2, 32], strides = [1, 1]} : vector<2x96xf32> to vector<2x32xf32>
    %88 = vector.extract_strided_slice %83 {offsets = [0, 64], sizes = [2, 32], strides = [1, 1]} : vector<2x96xf32> to vector<2x32xf32>
    %89 = arith.mulf %87, %70 : vector<2x32xf32>
    %90 = arith.mulf %86, %85 : vector<2x32xf32>
    %91 = arith.addf %89, %90 : vector<2x32xf32>
    %92 = math.tanh %91 : vector<2x32xf32>
    %93 = arith.mulf %88, %92 : vector<2x32xf32>
    %94 = arith.truncf %93 : vector<2x32xf32> to vector<2x32xbf16>
    %c6 = arith.constant 6 : index
    %c0_25 = arith.constant 0 : index
    %95 = vector.load %arg14[%c6, %c0_25] : memref<16x32xf32, #tpu.memory_space<vmem>>, vector<2x32xf32>
    tpu.vector_store %arg14[%c6, %c0_25], %93 {strides = array<i32>} : memref<16x32xf32, #tpu.memory_space<vmem>>, vector<2x32xf32>,
    %96 = vector.extract_strided_slice %6 {offsets = [8, 0], sizes = [2, 128], strides = [1, 1]} : vector<16x128xf32> to vector<2x128xf32>
    %cst_26 = arith.constant dense<0.000000e+00> : vector<2x128xf32>
    %97 = tpu.matmul %94, %1, %cst_26 {dimension_numbers = #tpu.dot_dimension_numbers<[1], [0], [0], [1], [0, 0, 1, 1], [], []>} : vector<2x32xbf16>, vector<32x128xbf16>, vector<2x128xf32> -> vector<2x128xf32>
    %98 = arith.addf %96, %97 : vector<2x128xf32>
    %99 = vector.extract_strided_slice %98 {offsets = [0, 0], sizes = [2, 96], strides = [1, 1]} : vector<2x128xf32> to vector<2x96xf32>
    %100 = arith.negf %99 : vector<2x96xf32>
    %101 = math.exp %100 : vector<2x96xf32>
    %cst_27 = arith.constant 1.000000e+00 : f32
    %102 = vector.broadcast %cst_27 : f32 to vector<2x96xf32>
    %103 = arith.addf %102, %101 : vector<2x96xf32>
    %104 = arith.divf %102, %103 : vector<2x96xf32>
    %105 = vector.extract_strided_slice %98 {offsets = [0, 96], sizes = [2, 32], strides = [1, 1]} : vector<2x128xf32> to vector<2x32xf32>
    %106 = math.tanh %105 : vector<2x32xf32>
    %107 = vector.extract_strided_slice %104 {offsets = [0, 0], sizes = [2, 32], strides = [1, 1]} : vector<2x96xf32> to vector<2x32xf32>
    %108 = vector.extract_strided_slice %104 {offsets = [0, 32], sizes = [2, 32], strides = [1, 1]} : vector<2x96xf32> to vector<2x32xf32>
    %109 = vector.extract_strided_slice %104 {offsets = [0, 64], sizes = [2, 32], strides = [1, 1]} : vector<2x96xf32> to vector<2x32xf32>
    %110 = arith.mulf %108, %91 : vector<2x32xf32>
    %111 = arith.mulf %107, %106 : vector<2x32xf32>
    %112 = arith.addf %110, %111 : vector<2x32xf32>
    %113 = math.tanh %112 : vector<2x32xf32>
    %114 = arith.mulf %109, %113 : vector<2x32xf32>
    %115 = arith.truncf %114 : vector<2x32xf32> to vector<2x32xbf16>
    %c8 = arith.constant 8 : index
    %c0_28 = arith.constant 0 : index
    %116 = vector.load %arg14[%c8, %c0_28] : memref<16x32xf32, #tpu.memory_space<vmem>>, vector<2x32xf32>
    tpu.vector_store %arg14[%c8, %c0_28], %114 {strides = array<i32>} : memref<16x32xf32, #tpu.memory_space<vmem>>, vector<2x32xf32>,
    %117 = vector.extract_strided_slice %6 {offsets = [10, 0], sizes = [2, 128], strides = [1, 1]} : vector<16x128xf32> to vector<2x128xf32>
    %cst_29 = arith.constant dense<0.000000e+00> : vector<2x128xf32>
    %118 = tpu.matmul %115, %1, %cst_29 {dimension_numbers = #tpu.dot_dimension_numbers<[1], [0], [0], [1], [0, 0, 1, 1], [], []>} : vector<2x32xbf16>, vector<32x128xbf16>, vector<2x128xf32> -> vector<2x128xf32>
    %119 = arith.addf %117, %118 : vector<2x128xf32>
    %120 = vector.extract_strided_slice %119 {offsets = [0, 0], sizes = [2, 96], strides = [1, 1]} : vector<2x128xf32> to vector<2x96xf32>
    %121 = arith.negf %120 : vector<2x96xf32>
    %122 = math.exp %121 : vector<2x96xf32>
    %cst_30 = arith.constant 1.000000e+00 : f32
    %123 = vector.broadcast %cst_30 : f32 to vector<2x96xf32>
    %124 = arith.addf %123, %122 : vector<2x96xf32>
    %125 = arith.divf %123, %124 : vector<2x96xf32>
    %126 = vector.extract_strided_slice %119 {offsets = [0, 96], sizes = [2, 32], strides = [1, 1]} : vector<2x128xf32> to vector<2x32xf32>
    %127 = math.tanh %126 : vector<2x32xf32>
    %128 = vector.extract_strided_slice %125 {offsets = [0, 0], sizes = [2, 32], strides = [1, 1]} : vector<2x96xf32> to vector<2x32xf32>
    %129 = vector.extract_strided_slice %125 {offsets = [0, 32], sizes = [2, 32], strides = [1, 1]} : vector<2x96xf32> to vector<2x32xf32>
    %130 = vector.extract_strided_slice %125 {offsets = [0, 64], sizes = [2, 32], strides = [1, 1]} : vector<2x96xf32> to vector<2x32xf32>
    %131 = arith.mulf %129, %112 : vector<2x32xf32>
    %132 = arith.mulf %128, %127 : vector<2x32xf32>
    %133 = arith.addf %131, %132 : vector<2x32xf32>
    %134 = math.tanh %133 : vector<2x32xf32>
    %135 = arith.mulf %130, %134 : vector<2x32xf32>
    %136 = arith.truncf %135 : vector<2x32xf32> to vector<2x32xbf16>
    %c10 = arith.constant 10 : index
    %c0_31 = arith.constant 0 : index
    %137 = vector.load %arg14[%c10, %c0_31] : memref<16x32xf32, #tpu.memory_space<vmem>>, vector<2x32xf32>
    tpu.vector_store %arg14[%c10, %c0_31], %135 {strides = array<i32>} : memref<16x32xf32, #tpu.memory_space<vmem>>, vector<2x32xf32>,
    %138 = vector.extract_strided_slice %6 {offsets = [12, 0], sizes = [2, 128], strides = [1, 1]} : vector<16x128xf32> to vector<2x128xf32>
    %cst_32 = arith.constant dense<0.000000e+00> : vector<2x128xf32>
    %139 = tpu.matmul %136, %1, %cst_32 {dimension_numbers = #tpu.dot_dimension_numbers<[1], [0], [0], [1], [0, 0, 1, 1], [], []>} : vector<2x32xbf16>, vector<32x128xbf16>, vector<2x128xf32> -> vector<2x128xf32>
    %140 = arith.addf %138, %139 : vector<2x128xf32>
    %141 = vector.extract_strided_slice %140 {offsets = [0, 0], sizes = [2, 96], strides = [1, 1]} : vector<2x128xf32> to vector<2x96xf32>
    %142 = arith.negf %141 : vector<2x96xf32>
    %143 = math.exp %142 : vector<2x96xf32>
    %cst_33 = arith.constant 1.000000e+00 : f32
    %144 = vector.broadcast %cst_33 : f32 to vector<2x96xf32>
    %145 = arith.addf %144, %143 : vector<2x96xf32>
    %146 = arith.divf %144, %145 : vector<2x96xf32>
    %147 = vector.extract_strided_slice %140 {offsets = [0, 96], sizes = [2, 32], strides = [1, 1]} : vector<2x128xf32> to vector<2x32xf32>
    %148 = math.tanh %147 : vector<2x32xf32>
    %149 = vector.extract_strided_slice %146 {offsets = [0, 0], sizes = [2, 32], strides = [1, 1]} : vector<2x96xf32> to vector<2x32xf32>
    %150 = vector.extract_strided_slice %146 {offsets = [0, 32], sizes = [2, 32], strides = [1, 1]} : vector<2x96xf32> to vector<2x32xf32>
    %151 = vector.extract_strided_slice %146 {offsets = [0, 64], sizes = [2, 32], strides = [1, 1]} : vector<2x96xf32> to vector<2x32xf32>
    %152 = arith.mulf %150, %133 : vector<2x32xf32>
    %153 = arith.mulf %149, %148 : vector<2x32xf32>
    %154 = arith.addf %152, %153 : vector<2x32xf32>
    %155 = math.tanh %154 : vector<2x32xf32>
    %156 = arith.mulf %151, %155 : vector<2x32xf32>
    %157 = arith.truncf %156 : vector<2x32xf32> to vector<2x32xbf16>
    %c12 = arith.constant 12 : index
    %c0_34 = arith.constant 0 : index
    %158 = vector.load %arg14[%c12, %c0_34] : memref<16x32xf32, #tpu.memory_space<vmem>>, vector<2x32xf32>
    tpu.vector_store %arg14[%c12, %c0_34], %156 {strides = array<i32>} : memref<16x32xf32, #tpu.memory_space<vmem>>, vector<2x32xf32>,
    %159 = vector.extract_strided_slice %6 {offsets = [14, 0], sizes = [2, 128], strides = [1, 1]} : vector<16x128xf32> to vector<2x128xf32>
    %cst_35 = arith.constant dense<0.000000e+00> : vector<2x128xf32>
    %160 = tpu.matmul %157, %1, %cst_35 {dimension_numbers = #tpu.dot_dimension_numbers<[1], [0], [0], [1], [0, 0, 1, 1], [], []>} : vector<2x32xbf16>, vector<32x128xbf16>, vector<2x128xf32> -> vector<2x128xf32>
    %161 = arith.addf %159, %160 : vector<2x128xf32>
    %162 = vector.extract_strided_slice %161 {offsets = [0, 0], sizes = [2, 96], strides = [1, 1]} : vector<2x128xf32> to vector<2x96xf32>
    %163 = arith.negf %162 : vector<2x96xf32>
    %164 = math.exp %163 : vector<2x96xf32>
    %cst_36 = arith.constant 1.000000e+00 : f32
    %165 = vector.broadcast %cst_36 : f32 to vector<2x96xf32>
    %166 = arith.addf %165, %164 : vector<2x96xf32>
    %167 = arith.divf %165, %166 : vector<2x96xf32>
    %168 = vector.extract_strided_slice %161 {offsets = [0, 96], sizes = [2, 32], strides = [1, 1]} : vector<2x128xf32> to vector<2x32xf32>
    %169 = math.tanh %168 : vector<2x32xf32>
    %170 = vector.extract_strided_slice %167 {offsets = [0, 0], sizes = [2, 32], strides = [1, 1]} : vector<2x96xf32> to vector<2x32xf32>
    %171 = vector.extract_strided_slice %167 {offsets = [0, 32], sizes = [2, 32], strides = [1, 1]} : vector<2x96xf32> to vector<2x32xf32>
    %172 = vector.extract_strided_slice %167 {offsets = [0, 64], sizes = [2, 32], strides = [1, 1]} : vector<2x96xf32> to vector<2x32xf32>
    %173 = arith.mulf %171, %154 : vector<2x32xf32>
    %174 = arith.mulf %170, %169 : vector<2x32xf32>
    %175 = arith.addf %173, %174 : vector<2x32xf32>
    %176 = math.tanh %175 : vector<2x32xf32>
    %177 = arith.mulf %172, %176 : vector<2x32xf32>
    %c14 = arith.constant 14 : index
    %c0_37 = arith.constant 0 : index
    %178 = vector.load %arg14[%c14, %c0_37] : memref<16x32xf32, #tpu.memory_space<vmem>>, vector<2x32xf32>
    tpu.vector_store %arg14[%c14, %c0_37], %177 {strides = array<i32>} : memref<16x32xf32, #tpu.memory_space<vmem>>, vector<2x32xf32>,
    %c0_38 = arith.constant 0 : index
    %c0_39 = arith.constant 0 : index
    %c0_40 = arith.constant 0 : index
    %179 = vector.load %arg12[%c0_38, %c0_39, %c0_40] : memref<2x2x32xf32, #tpu.memory_space<vmem>>, vector<1x2x32xf32>
    %180 = vector.shape_cast %179 : vector<1x2x32xf32> to vector<2x32xf32>
    %181 = vector.shape_cast %177 : vector<2x32xf32> to vector<1x2x32xf32>
    tpu.vector_store %arg12[%c0_38, %c0_39, %c0_40], %181 {strides = array<i32>} : memref<2x2x32xf32, #tpu.memory_space<vmem>>, vector<1x2x32xf32>,
    %c0_41 = arith.constant 0 : index
    %c0_42 = arith.constant 0 : index
    %c0_43 = arith.constant 0 : index
    %182 = vector.load %arg13[%c0_41, %c0_42, %c0_43] : memref<2x2x32xf32, #tpu.memory_space<vmem>>, vector<1x2x32xf32>
    %183 = vector.shape_cast %182 : vector<1x2x32xf32> to vector<2x32xf32>
    %184 = vector.shape_cast %175 : vector<2x32xf32> to vector<1x2x32xf32>
    tpu.vector_store %arg13[%c0_41, %c0_42, %c0_43], %184 {strides = array<i32>} : memref<2x2x32xf32, #tpu.memory_space<vmem>>, vector<1x2x32xf32>,
    %c0_44 = arith.constant 0 : index
    %c0_45 = arith.constant 0 : index
    %185 = vector.load %arg6[%c0_44, %c0_45] : memref<32x128xbf16, #tpu.memory_space<vmem>>, vector<32x128xbf16>
    %c0_46 = arith.constant 0 : index
    %c0_47 = arith.constant 0 : index
    %186 = vector.load %arg7[%c0_46, %c0_47] : memref<32x128xbf16, #tpu.memory_space<vmem>>, vector<32x128xbf16>
    %c0_48 = arith.constant 0 : index
    %c0_49 = arith.constant 0 : index
    %187 = vector.load %arg8[%c0_48, %c0_49] : memref<1x128xf32, #tpu.memory_space<vmem>>, vector<1x128xf32>
    %c0_50 = arith.constant 0 : index
    %c0_51 = arith.constant 0 : index
    %188 = vector.load %arg14[%c0_50, %c0_51] : memref<16x32xf32, #tpu.memory_space<vmem>>, vector<16x32xf32>
    %189 = arith.truncf %188 : vector<16x32xf32> to vector<16x32xbf16>
    %cst_52 = arith.constant dense<0.000000e+00> : vector<16x128xf32>
    %190 = tpu.matmul %189, %185, %cst_52 {dimension_numbers = #tpu.dot_dimension_numbers<[1], [0], [0], [1], [0, 0, 1, 1], [], []>} : vector<16x32xbf16>, vector<32x128xbf16>, vector<16x128xf32> -> vector<16x128xf32>
    %191 = vector.broadcast %187 : vector<1x128xf32> to vector<16x128xf32>
    %192 = arith.addf %190, %191 : vector<16x128xf32>
    %c1 = arith.constant 1 : index
    %c0_53 = arith.constant 0 : index
    %c0_54 = arith.constant 0 : index
    %193 = vector.load %arg1[%c1, %c0_53, %c0_54] : memref<2x2x32xf32, #tpu.memory_space<vmem>>, vector<1x2x32xf32>
    %194 = vector.shape_cast %193 : vector<1x2x32xf32> to vector<2x32xf32>
    %c1_55 = arith.constant 1 : index
    %c0_56 = arith.constant 0 : index
    %c0_57 = arith.constant 0 : index
    %195 = vector.load %arg2[%c1_55, %c0_56, %c0_57] : memref<2x2x32xf32, #tpu.memory_space<vmem>>, vector<1x2x32xf32>
    %196 = vector.shape_cast %195 : vector<1x2x32xf32> to vector<2x32xf32>
    %197 = arith.truncf %194 : vector<2x32xf32> to vector<2x32xbf16>
    %198 = vector.extract_strided_slice %192 {offsets = [0, 0], sizes = [2, 128], strides = [1, 1]} : vector<16x128xf32> to vector<2x128xf32>
    %cst_58 = arith.constant dense<0.000000e+00> : vector<2x128xf32>
    %199 = tpu.matmul %197, %186, %cst_58 {dimension_numbers = #tpu.dot_dimension_numbers<[1], [0], [0], [1], [0, 0, 1, 1], [], []>} : vector<2x32xbf16>, vector<32x128xbf16>, vector<2x128xf32> -> vector<2x128xf32>
    %200 = arith.addf %198, %199 : vector<2x128xf32>
    %201 = vector.extract_strided_slice %200 {offsets = [0, 0], sizes = [2, 96], strides = [1, 1]} : vector<2x128xf32> to vector<2x96xf32>
    %202 = arith.negf %201 : vector<2x96xf32>
    %203 = math.exp %202 : vector<2x96xf32>
    %cst_59 = arith.constant 1.000000e+00 : f32
    %204 = vector.broadcast %cst_59 : f32 to vector<2x96xf32>
    %205 = arith.addf %204, %203 : vector<2x96xf32>
    %206 = arith.divf %204, %205 : vector<2x96xf32>
    %207 = vector.extract_strided_slice %200 {offsets = [0, 96], sizes = [2, 32], strides = [1, 1]} : vector<2x128xf32> to vector<2x32xf32>
    %208 = math.tanh %207 : vector<2x32xf32>
    %209 = vector.extract_strided_slice %206 {offsets = [0, 0], sizes = [2, 32], strides = [1, 1]} : vector<2x96xf32> to vector<2x32xf32>
    %210 = vector.extract_strided_slice %206 {offsets = [0, 32], sizes = [2, 32], strides = [1, 1]} : vector<2x96xf32> to vector<2x32xf32>
    %211 = vector.extract_strided_slice %206 {offsets = [0, 64], sizes = [2, 32], strides = [1, 1]} : vector<2x96xf32> to vector<2x32xf32>
    %212 = arith.mulf %210, %196 : vector<2x32xf32>
    %213 = arith.mulf %209, %208 : vector<2x32xf32>
    %214 = arith.addf %212, %213 : vector<2x32xf32>
    %215 = math.tanh %214 : vector<2x32xf32>
    %216 = arith.mulf %211, %215 : vector<2x32xf32>
    %217 = arith.truncf %216 : vector<2x32xf32> to vector<2x32xbf16>
    %218 = vector.extract_strided_slice %192 {offsets = [2, 0], sizes = [2, 128], strides = [1, 1]} : vector<16x128xf32> to vector<2x128xf32>
    %cst_60 = arith.constant dense<0.000000e+00> : vector<2x128xf32>
    %219 = tpu.matmul %217, %186, %cst_60 {dimension_numbers = #tpu.dot_dimension_numbers<[1], [0], [0], [1], [0, 0, 1, 1], [], []>} : vector<2x32xbf16>, vector<32x128xbf16>, vector<2x128xf32> -> vector<2x128xf32>
    %220 = arith.addf %218, %219 : vector<2x128xf32>
    %221 = vector.extract_strided_slice %220 {offsets = [0, 0], sizes = [2, 96], strides = [1, 1]} : vector<2x128xf32> to vector<2x96xf32>
    %222 = arith.negf %221 : vector<2x96xf32>
    %223 = math.exp %222 : vector<2x96xf32>
    %cst_61 = arith.constant 1.000000e+00 : f32
    %224 = vector.broadcast %cst_61 : f32 to vector<2x96xf32>
    %225 = arith.addf %224, %223 : vector<2x96xf32>
    %226 = arith.divf %224, %225 : vector<2x96xf32>
    %227 = vector.extract_strided_slice %220 {offsets = [0, 96], sizes = [2, 32], strides = [1, 1]} : vector<2x128xf32> to vector<2x32xf32>
    %228 = math.tanh %227 : vector<2x32xf32>
    %229 = vector.extract_strided_slice %226 {offsets = [0, 0], sizes = [2, 32], strides = [1, 1]} : vector<2x96xf32> to vector<2x32xf32>
    %230 = vector.extract_strided_slice %226 {offsets = [0, 32], sizes = [2, 32], strides = [1, 1]} : vector<2x96xf32> to vector<2x32xf32>
    %231 = vector.extract_strided_slice %226 {offsets = [0, 64], sizes = [2, 32], strides = [1, 1]} : vector<2x96xf32> to vector<2x32xf32>
    %232 = arith.mulf %230, %214 : vector<2x32xf32>
    %233 = arith.mulf %229, %228 : vector<2x32xf32>
    %234 = arith.addf %232, %233 : vector<2x32xf32>
    %235 = math.tanh %234 : vector<2x32xf32>
    %236 = arith.mulf %231, %235 : vector<2x32xf32>
    %237 = arith.truncf %236 : vector<2x32xf32> to vector<2x32xbf16>
    %238 = vector.extract_strided_slice %192 {offsets = [4, 0], sizes = [2, 128], strides = [1, 1]} : vector<16x128xf32> to vector<2x128xf32>
    %cst_62 = arith.constant dense<0.000000e+00> : vector<2x128xf32>
    %239 = tpu.matmul %237, %186, %cst_62 {dimension_numbers = #tpu.dot_dimension_numbers<[1], [0], [0], [1], [0, 0, 1, 1], [], []>} : vector<2x32xbf16>, vector<32x128xbf16>, vector<2x128xf32> -> vector<2x128xf32>
    %240 = arith.addf %238, %239 : vector<2x128xf32>
    %241 = vector.extract_strided_slice %240 {offsets = [0, 0], sizes = [2, 96], strides = [1, 1]} : vector<2x128xf32> to vector<2x96xf32>
    %242 = arith.negf %241 : vector<2x96xf32>
    %243 = math.exp %242 : vector<2x96xf32>
    %cst_63 = arith.constant 1.000000e+00 : f32
    %244 = vector.broadcast %cst_63 : f32 to vector<2x96xf32>
    %245 = arith.addf %244, %243 : vector<2x96xf32>
    %246 = arith.divf %244, %245 : vector<2x96xf32>
    %247 = vector.extract_strided_slice %240 {offsets = [0, 96], sizes = [2, 32], strides = [1, 1]} : vector<2x128xf32> to vector<2x32xf32>
    %248 = math.tanh %247 : vector<2x32xf32>
    %249 = vector.extract_strided_slice %246 {offsets = [0, 0], sizes = [2, 32], strides = [1, 1]} : vector<2x96xf32> to vector<2x32xf32>
    %250 = vector.extract_strided_slice %246 {offsets = [0, 32], sizes = [2, 32], strides = [1, 1]} : vector<2x96xf32> to vector<2x32xf32>
    %251 = vector.extract_strided_slice %246 {offsets = [0, 64], sizes = [2, 32], strides = [1, 1]} : vector<2x96xf32> to vector<2x32xf32>
    %252 = arith.mulf %250, %234 : vector<2x32xf32>
    %253 = arith.mulf %249, %248 : vector<2x32xf32>
    %254 = arith.addf %252, %253 : vector<2x32xf32>
    %255 = math.tanh %254 : vector<2x32xf32>
    %256 = arith.mulf %251, %255 : vector<2x32xf32>
    %257 = arith.truncf %256 : vector<2x32xf32> to vector<2x32xbf16>
    %258 = vector.extract_strided_slice %192 {offsets = [6, 0], sizes = [2, 128], strides = [1, 1]} : vector<16x128xf32> to vector<2x128xf32>
    %cst_64 = arith.constant dense<0.000000e+00> : vector<2x128xf32>
    %259 = tpu.matmul %257, %186, %cst_64 {dimension_numbers = #tpu.dot_dimension_numbers<[1], [0], [0], [1], [0, 0, 1, 1], [], []>} : vector<2x32xbf16>, vector<32x128xbf16>, vector<2x128xf32> -> vector<2x128xf32>
    %260 = arith.addf %258, %259 : vector<2x128xf32>
    %261 = vector.extract_strided_slice %260 {offsets = [0, 0], sizes = [2, 96], strides = [1, 1]} : vector<2x128xf32> to vector<2x96xf32>
    %262 = arith.negf %261 : vector<2x96xf32>
    %263 = math.exp %262 : vector<2x96xf32>
    %cst_65 = arith.constant 1.000000e+00 : f32
    %264 = vector.broadcast %cst_65 : f32 to vector<2x96xf32>
    %265 = arith.addf %264, %263 : vector<2x96xf32>
    %266 = arith.divf %264, %265 : vector<2x96xf32>
    %267 = vector.extract_strided_slice %260 {offsets = [0, 96], sizes = [2, 32], strides = [1, 1]} : vector<2x128xf32> to vector<2x32xf32>
    %268 = math.tanh %267 : vector<2x32xf32>
    %269 = vector.extract_strided_slice %266 {offsets = [0, 0], sizes = [2, 32], strides = [1, 1]} : vector<2x96xf32> to vector<2x32xf32>
    %270 = vector.extract_strided_slice %266 {offsets = [0, 32], sizes = [2, 32], strides = [1, 1]} : vector<2x96xf32> to vector<2x32xf32>
    %271 = vector.extract_strided_slice %266 {offsets = [0, 64], sizes = [2, 32], strides = [1, 1]} : vector<2x96xf32> to vector<2x32xf32>
    %272 = arith.mulf %270, %254 : vector<2x32xf32>
    %273 = arith.mulf %269, %268 : vector<2x32xf32>
    %274 = arith.addf %272, %273 : vector<2x32xf32>
    %275 = math.tanh %274 : vector<2x32xf32>
    %276 = arith.mulf %271, %275 : vector<2x32xf32>
    %277 = arith.truncf %276 : vector<2x32xf32> to vector<2x32xbf16>
    %278 = vector.extract_strided_slice %192 {offsets = [8, 0], sizes = [2, 128], strides = [1, 1]} : vector<16x128xf32> to vector<2x128xf32>
    %cst_66 = arith.constant dense<0.000000e+00> : vector<2x128xf32>
    %279 = tpu.matmul %277, %186, %cst_66 {dimension_numbers = #tpu.dot_dimension_numbers<[1], [0], [0], [1], [0, 0, 1, 1], [], []>} : vector<2x32xbf16>, vector<32x128xbf16>, vector<2x128xf32> -> vector<2x128xf32>
    %280 = arith.addf %278, %279 : vector<2x128xf32>
    %281 = vector.extract_strided_slice %280 {offsets = [0, 0], sizes = [2, 96], strides = [1, 1]} : vector<2x128xf32> to vector<2x96xf32>
    %282 = arith.negf %281 : vector<2x96xf32>
    %283 = math.exp %282 : vector<2x96xf32>
    %cst_67 = arith.constant 1.000000e+00 : f32
    %284 = vector.broadcast %cst_67 : f32 to vector<2x96xf32>
    %285 = arith.addf %284, %283 : vector<2x96xf32>
    %286 = arith.divf %284, %285 : vector<2x96xf32>
    %287 = vector.extract_strided_slice %280 {offsets = [0, 96], sizes = [2, 32], strides = [1, 1]} : vector<2x128xf32> to vector<2x32xf32>
    %288 = math.tanh %287 : vector<2x32xf32>
    %289 = vector.extract_strided_slice %286 {offsets = [0, 0], sizes = [2, 32], strides = [1, 1]} : vector<2x96xf32> to vector<2x32xf32>
    %290 = vector.extract_strided_slice %286 {offsets = [0, 32], sizes = [2, 32], strides = [1, 1]} : vector<2x96xf32> to vector<2x32xf32>
    %291 = vector.extract_strided_slice %286 {offsets = [0, 64], sizes = [2, 32], strides = [1, 1]} : vector<2x96xf32> to vector<2x32xf32>
    %292 = arith.mulf %290, %274 : vector<2x32xf32>
    %293 = arith.mulf %289, %288 : vector<2x32xf32>
    %294 = arith.addf %292, %293 : vector<2x32xf32>
    %295 = math.tanh %294 : vector<2x32xf32>
    %296 = arith.mulf %291, %295 : vector<2x32xf32>
    %297 = arith.truncf %296 : vector<2x32xf32> to vector<2x32xbf16>
    %298 = vector.extract_strided_slice %192 {offsets = [10, 0], sizes = [2, 128], strides = [1, 1]} : vector<16x128xf32> to vector<2x128xf32>
    %cst_68 = arith.constant dense<0.000000e+00> : vector<2x128xf32>
    %299 = tpu.matmul %297, %186, %cst_68 {dimension_numbers = #tpu.dot_dimension_numbers<[1], [0], [0], [1], [0, 0, 1, 1], [], []>} : vector<2x32xbf16>, vector<32x128xbf16>, vector<2x128xf32> -> vector<2x128xf32>
    %300 = arith.addf %298, %299 : vector<2x128xf32>
    %301 = vector.extract_strided_slice %300 {offsets = [0, 0], sizes = [2, 96], strides = [1, 1]} : vector<2x128xf32> to vector<2x96xf32>
    %302 = arith.negf %301 : vector<2x96xf32>
    %303 = math.exp %302 : vector<2x96xf32>
    %cst_69 = arith.constant 1.000000e+00 : f32
    %304 = vector.broadcast %cst_69 : f32 to vector<2x96xf32>
    %305 = arith.addf %304, %303 : vector<2x96xf32>
    %306 = arith.divf %304, %305 : vector<2x96xf32>
    %307 = vector.extract_strided_slice %300 {offsets = [0, 96], sizes = [2, 32], strides = [1, 1]} : vector<2x128xf32> to vector<2x32xf32>
    %308 = math.tanh %307 : vector<2x32xf32>
    %309 = vector.extract_strided_slice %306 {offsets = [0, 0], sizes = [2, 32], strides = [1, 1]} : vector<2x96xf32> to vector<2x32xf32>
    %310 = vector.extract_strided_slice %306 {offsets = [0, 32], sizes = [2, 32], strides = [1, 1]} : vector<2x96xf32> to vector<2x32xf32>
    %311 = vector.extract_strided_slice %306 {offsets = [0, 64], sizes = [2, 32], strides = [1, 1]} : vector<2x96xf32> to vector<2x32xf32>
    %312 = arith.mulf %310, %294 : vector<2x32xf32>
    %313 = arith.mulf %309, %308 : vector<2x32xf32>
    %314 = arith.addf %312, %313 : vector<2x32xf32>
    %315 = math.tanh %314 : vector<2x32xf32>
    %316 = arith.mulf %311, %315 : vector<2x32xf32>
    %317 = arith.truncf %316 : vector<2x32xf32> to vector<2x32xbf16>
    %318 = vector.extract_strided_slice %192 {offsets = [12, 0], sizes = [2, 128], strides = [1, 1]} : vector<16x128xf32> to vector<2x128xf32>
    %cst_70 = arith.constant dense<0.000000e+00> : vector<2x128xf32>
    %319 = tpu.matmul %317, %186, %cst_70 {dimension_numbers = #tpu.dot_dimension_numbers<[1], [0], [0], [1], [0, 0, 1, 1], [], []>} : vector<2x32xbf16>, vector<32x128xbf16>, vector<2x128xf32> -> vector<2x128xf32>
    %320 = arith.addf %318, %319 : vector<2x128xf32>
    %321 = vector.extract_strided_slice %320 {offsets = [0, 0], sizes = [2, 96], strides = [1, 1]} : vector<2x128xf32> to vector<2x96xf32>
    %322 = arith.negf %321 : vector<2x96xf32>
    %323 = math.exp %322 : vector<2x96xf32>
    %cst_71 = arith.constant 1.000000e+00 : f32
    %324 = vector.broadcast %cst_71 : f32 to vector<2x96xf32>
    %325 = arith.addf %324, %323 : vector<2x96xf32>
    %326 = arith.divf %324, %325 : vector<2x96xf32>
    %327 = vector.extract_strided_slice %320 {offsets = [0, 96], sizes = [2, 32], strides = [1, 1]} : vector<2x128xf32> to vector<2x32xf32>
    %328 = math.tanh %327 : vector<2x32xf32>
    %329 = vector.extract_strided_slice %326 {offsets = [0, 0], sizes = [2, 32], strides = [1, 1]} : vector<2x96xf32> to vector<2x32xf32>
    %330 = vector.extract_strided_slice %326 {offsets = [0, 32], sizes = [2, 32], strides = [1, 1]} : vector<2x96xf32> to vector<2x32xf32>
    %331 = vector.extract_strided_slice %326 {offsets = [0, 64], sizes = [2, 32], strides = [1, 1]} : vector<2x96xf32> to vector<2x32xf32>
    %332 = arith.mulf %330, %314 : vector<2x32xf32>
    %333 = arith.mulf %329, %328 : vector<2x32xf32>
    %334 = arith.addf %332, %333 : vector<2x32xf32>
    %335 = math.tanh %334 : vector<2x32xf32>
    %336 = arith.mulf %331, %335 : vector<2x32xf32>
    %337 = arith.truncf %336 : vector<2x32xf32> to vector<2x32xbf16>
    %338 = vector.extract_strided_slice %192 {offsets = [14, 0], sizes = [2, 128], strides = [1, 1]} : vector<16x128xf32> to vector<2x128xf32>
    %cst_72 = arith.constant dense<0.000000e+00> : vector<2x128xf32>
    %339 = tpu.matmul %337, %186, %cst_72 {dimension_numbers = #tpu.dot_dimension_numbers<[1], [0], [0], [1], [0, 0, 1, 1], [], []>} : vector<2x32xbf16>, vector<32x128xbf16>, vector<2x128xf32> -> vector<2x128xf32>
    %340 = arith.addf %338, %339 : vector<2x128xf32>
    %341 = vector.extract_strided_slice %340 {offsets = [0, 0], sizes = [2, 96], strides = [1, 1]} : vector<2x128xf32> to vector<2x96xf32>
    %342 = arith.negf %341 : vector<2x96xf32>
    %343 = math.exp %342 : vector<2x96xf32>
    %cst_73 = arith.constant 1.000000e+00 : f32
    %344 = vector.broadcast %cst_73 : f32 to vector<2x96xf32>
    %345 = arith.addf %344, %343 : vector<2x96xf32>
    %346 = arith.divf %344, %345 : vector<2x96xf32>
    %347 = vector.extract_strided_slice %340 {offsets = [0, 96], sizes = [2, 32], strides = [1, 1]} : vector<2x128xf32> to vector<2x32xf32>
    %348 = math.tanh %347 : vector<2x32xf32>
    %349 = vector.extract_strided_slice %346 {offsets = [0, 0], sizes = [2, 32], strides = [1, 1]} : vector<2x96xf32> to vector<2x32xf32>
    %350 = vector.extract_strided_slice %346 {offsets = [0, 32], sizes = [2, 32], strides = [1, 1]} : vector<2x96xf32> to vector<2x32xf32>
    %351 = vector.extract_strided_slice %346 {offsets = [0, 64], sizes = [2, 32], strides = [1, 1]} : vector<2x96xf32> to vector<2x32xf32>
    %352 = arith.mulf %350, %334 : vector<2x32xf32>
    %353 = arith.mulf %349, %348 : vector<2x32xf32>
    %354 = arith.addf %352, %353 : vector<2x32xf32>
    %355 = math.tanh %354 : vector<2x32xf32>
    %356 = arith.mulf %351, %355 : vector<2x32xf32>
    %c1_74 = arith.constant 1 : index
    %c0_75 = arith.constant 0 : index
    %c0_76 = arith.constant 0 : index
    %357 = vector.load %arg12[%c1_74, %c0_75, %c0_76] : memref<2x2x32xf32, #tpu.memory_space<vmem>>, vector<1x2x32xf32>
    %358 = vector.shape_cast %357 : vector<1x2x32xf32> to vector<2x32xf32>
    %359 = vector.shape_cast %356 : vector<2x32xf32> to vector<1x2x32xf32>
    tpu.vector_store %arg12[%c1_74, %c0_75, %c0_76], %359 {strides = array<i32>} : memref<2x2x32xf32, #tpu.memory_space<vmem>>, vector<1x2x32xf32>,
    %c1_77 = arith.constant 1 : index
    %c0_78 = arith.constant 0 : index
    %c0_79 = arith.constant 0 : index
    %360 = vector.load %arg13[%c1_77, %c0_78, %c0_79] : memref<2x2x32xf32, #tpu.memory_space<vmem>>, vector<1x2x32xf32>
    %361 = vector.shape_cast %360 : vector<1x2x32xf32> to vector<2x32xf32>
    %362 = vector.shape_cast %354 : vector<2x32xf32> to vector<1x2x32xf32>
    tpu.vector_store %arg13[%c1_77, %c0_78, %c0_79], %362 {strides = array<i32>} : memref<2x2x32xf32, #tpu.memory_space<vmem>>, vector<1x2x32xf32>,
    %c0_80 = arith.constant 0 : index
    %c0_81 = arith.constant 0 : index
    %363 = vector.load %arg9[%c0_80, %c0_81] : memref<32x16xf32, #tpu.memory_space<vmem>>, vector<32x16xf32>
    %cst_82 = arith.constant dense<0.000000e+00> : vector<2x16xf32>
    %364 = tpu.matmul %356, %363, %cst_82 {dimension_numbers = #tpu.dot_dimension_numbers<[1], [0], [0], [1], [0, 0, 1, 1], [], []>} : vector<2x32xf32>, vector<32x16xf32>, vector<2x16xf32> -> vector<2x16xf32>
    %c0_83 = arith.constant 0 : index
    %c0_84 = arith.constant 0 : index
    %365 = vector.load %arg10[%c0_83, %c0_84] : memref<1x16xf32, #tpu.memory_space<vmem>>, vector<1x16xf32>
    %366 = vector.broadcast %365 : vector<1x16xf32> to vector<2x16xf32>
    %367 = arith.addf %364, %366 : vector<2x16xf32>
    %c0_85 = arith.constant 0 : index
    %c0_86 = arith.constant 0 : index
    %368 = vector.load %arg11[%c0_85, %c0_86] : memref<2x16xf32, #tpu.memory_space<vmem>>, vector<2x16xf32>
    tpu.vector_store %arg11[%c0_85, %c0_86], %367 {strides = array<i32>} : memref<2x16xf32, #tpu.memory_space<vmem>>, vector<2x16xf32>,
    return
  }
}

</mosaic_0001>

<bundles_post_ra>
// kernel: rnn_forward.1
= control target key start
LH: loop header
LB: loop body
LE: loop exit
PB: predicated region body
PF: predicated region fallthrough
CT: control target
= control target key end

     0   :  { %19 = vsyncpa [#allocation4], 0  ;;  %v2150_v1 = vmov 0.0   ;;  %vm2151_vm0 = vmmov 0   ;;  %vm78_vm1 = vcmask 261120   ;;  %s2601_s0 = inlined_call_operand.vmem [shape: bf16[16,32], index: 0, kind: input, shape index: {}]   ;;  %s2602_s1 = inlined_call_operand.vmem [shape: f32[2,2,32], index: 1, kind: input, shape index: {}]   ;;  %s2603_s2 = inlined_call_operand.vmem [shape: f32[2,2,32], index: 2, kind: input, shape index: {}]   ;;  %s2604_s3 = inlined_call_operand.vmem [shape: bf16[32,128], index: 3, kind: input, shape index: {}]   ;;  %s2605_s4 = inlined_call_operand.vmem [shape: bf16[32,128], index: 4, kind: input, shape index: {}]   ;;  %s2606_s5 = inlined_call_operand.vmem [shape: f32[1,128], index: 5, kind: input, shape index: {}]   ;;  %s2607_s6 = inlined_call_operand.vmem [shape: bf16[32,128], index: 6, kind: input, shape index: {}]   ;;  %s2608_s7 = inlined_call_operand.vmem [shape: bf16[32,128], index: 7, kind: input, shape index: {}]   ;;  %s2609_s8 = inlined_call_operand.vmem [shape: f32[1,128], index: 8, kind: input, shape index: {}]   ;;  %s2610_s9 = inlined_call_operand.vmem [shape: f32[32,16], index: 9, kind: input, shape index: {}]   ;;  %s2611_s10 = inlined_call_operand.vmem [shape: f32[1,16], index: 10, kind: input, shape index: {}]   ;;  %s2612_s11 = inlined_call_operand.hbm [shape: f32[2,16], index: 11, kind: output, shape index: {0}]   ;;  %s2613_s12 = inlined_call_operand.hbm [shape: f32[2,2,32], index: 12, kind: output, shape index: {1}]   ;;  %s2614_s13 = inlined_call_operand.hbm [shape: f32[2,2,32], index: 13, kind: output, shape index: {2}]  }
   0x1   :  { %v1943_v0 = vld [vmem:[%s2604_s3] sm:$0xff]   ;;  %1772 = vmatprep.subr.bf16.mxu0 %v2150_v1  ;;  %1780 = vmatprep.subr.bf16.mxu1 %v2150_v1  ;;  %v1945_v3 = vld [vmem:[%s2604_s3 + $0x8] sm:$0xff]  }
   0x2   :  { %v2238_v2 = vld [vmem:[%s2605_s4] sm:$0xff]   ;;  %1773 = vmatpush3.bf16.msra.mxu0 %v1943_v0  ;;  %1776 = vmatprep.mubr.msk.bf16.mxu0 %vm2151_vm0, %v2150_v1  ;;  %v2250_v4 = vld [vmem:[%s2605_s4 + $0x8] sm:$0xff]  }
   0x3   :  { %1781 = vmatpush3.bf16.msra.mxu1 %v2238_v2  ;;  %1774 = vmatprep.subr.bf16.mxu0 %v2150_v1  ;;  %v1947_v5 = vld [vmem:[%s2601_s0] sm:$0xff]  }
   0x4   :  { %1782 = vmatprep.subr.bf16.mxu1 %v2150_v1  ;;  %1784 = vmatprep.mubr.msk.bf16.mxu1 %vm2151_vm0, %v2150_v1  ;;  %v123_v6 = vld [vmem:[%s2602_s1] sm:$0x3] }
   0x5   :  { %v125_v7 = vpack.c.bf16 %v123_v6, %v123_v6 }
   0x6   :  { %1775 = vmatpush3.bf16.msra.mxu0 %v1945_v3 }
   0x7   :  { %1783 = vmatpush3.bf16.msra.mxu1 %v2250_v4  ;;  %1788 = vmatprep.subr.bf16.mxu0 %v2150_v1 }
   0x8   :  { %1796 = vmatprep.subr.bf16.mxu1 %v2150_v1 }
   0x9   :  { %20 = vsyncpa [#allocation6], 0  ;;  %1777 = vmatmul.mubr.msk.bf16.vlgmr.msra.gmra.mrb[0].mxu0 %vm78_vm1, %v1947_v5  ;;  %v1664_v8 = vld [vmem:[%s2606_s5] ss:$0 sm:$0xff]  ;;  %s2152_s19 = smov 32   ;;  %s2153_s21 = smov 64  }
   0xa   :  { %1785 = vmatmul.mubr.msk.bf16.vlgmr.msra.gmra.mrb[0].mxu1 %vm78_vm1, %v125_v7  ;;  %1789 = vmatpush3.bf16.msra.mxu0 %v2238_v2  ;;  %v124_v21 = vld [vmem:[%s2603_s2] sm:$0x3]  ;;  %vm215_vm2 = vcmask 254976   ;;  %vm384_vm3 = vcmask 259076   ;;  %vm299_vm4 = vcmask 257026   ;;  %vm469_vm5 = vcmask 261126  }
   0xb   :  { %1790 = vmatprep.subr.bf16.mxu0 %v2150_v1  ;;  %1792 = vmatprep.mubr.msk.bf16.mxu0 %vm2151_vm0, %v2150_v1  ;;  %s2155_s5 = smov 96  }
   0xc   :  { %1797 = vmatpush3.bf16.msra.mxu1 %v2238_v2  ;;  %1800 = vmatprep.mubr.msk.bf16.mxu1 %vm2151_vm0, %v2150_v1 }
   0xd   :  { %1798 = vmatprep.subr.bf16.mxu1 %v2150_v1 }
   0xe   :  { %1791 = vmatpush3.bf16.msra.mxu0 %v2250_v4 }
   0xf   :  { %1804 = vmatprep.subr.bf16.mxu0 %v2150_v1 }
  0x10   :  { %1799 = vmatpush3.bf16.msra.mxu1 %v2250_v4 }
  0x11   :  { %1812 = vmatprep.subr.bf16.mxu1 %v2150_v1 }
  0xdc   :  { %v116_v9 = vpop.f32.mrb[0].mxu0 }
  0xdd   :  { %v2281_v10 = vadd.f32 %v1664_v8, %v116_v9  ;;  %v175_v11 = vpop.f32.mrb[0].mxu1  ;;  %v1778_v12 = vpop.f32.mrb[1].mxu0 }
  0xde   :  { %v1786_v13 = vpop.f32.mrb[1].mxu1  ;;  %v119_v14 = vpop.f32.mrb[2].mxu0 }
  0xdf   :  { %v181_v15 = vadd.f32 %v175_v11, %v2281_v10  ;;  %v2284_v16 = vadd.f32 %v1664_v8, %v119_v14  ;;  %v178_v17 = vpop.f32.mrb[2].mxu1  ;;  %v1779_v18 = vpop.f32.mrb[3].mxu0 }
  0xe0   :  { %v1787_v19 = vpop.f32.mrb[3].mxu1 }
  0xe1   :  { %1952 = vtanh.f32 %v181_v15  ;;  %v1672_v22 = vmul.f32 -1.442695, %v181_v15 }
  0xe3   :  { %1954 = vpow2.f32 %v1672_v22 }
  0xeb   :  { %v1953_v20 = vpop.eup %1952 }
  0xec   :  { %195 = vrot.lane.b32.xlu0 %v1953_v20, %s2152_s19 }
  0xed   :  { %v1955_v23 = vpop.eup %1954 }
  0xee   :  { %v185_v24 = vadd.f32 1.0, %v1955_v23 }
  0xf0   :  { %190 = vrot.lane.b32.xlu0 %v124_v21, %s2152_s19  ;;  %1956 = vrcp.f32 %v185_v24 }
  0xfa   :  { %v1957_v25 = vpop.eup %1956 }
 0x15e   :  { %v196_v26 = vpop.permute.xlu0 %195 }
 0x15f   :  { %v198_v27 = vmul.f32 %v1957_v25, %v196_v26 }
 0x161   :  { %200 = vrot.lane.b32.xlu1 %v198_v27, %s2152_s19 }
 0x162   :  { %v191_v28 = vpop.permute.xlu0 %190 }
 0x163   :  { %v193_v29 = vmul.f32 %v1957_v25, %v191_v28 }
 0x1d3   :  { %v201_v30 = vpop.permute.xlu1 %200 }
 0x1d4   :  { %v203_v31 = vadd.f32 %v201_v30, %v193_v29 }
 0x1d6   :  { %1958 = vtanh.f32 %v203_v31  ;;  %v275_v50 = vrot.slane %v203_v31, 6 }
 0x1e0   :  { %v1959_v32 = vpop.eup %1958 }
 0x1e1   :  { %206 = vrot.lane.b32.xlu1 %v1959_v32, %s2152_s19 }
 0x253   :  { %v207_v33 = vpop.permute.xlu1 %206 }
 0x254   :  { %v2293_v34 = vmul.f32 %v1957_v25, %v207_v33 }
 0x256   :  { %v210_v35 = vpack.c.bf16 %v2293_v34, %v2293_v34 }
 0x258   :  { %218 = vrot.lane.b32.xlu0 %v210_v35, %s2153_s21 }
 0x2ca   :  { %v219_v36 = vpop.permute.xlu0 %218 }
 0x2cb   :  { %1793 = vmatmul.mubr.msk.bf16.vlgmr.msra.gmra.mrb[4].mxu0 %vm78_vm1, %v219_v36 }
 0x2cc   :  { %1805 = vmatpush3.bf16.msra.mxu0 %v2238_v2  ;;  %1808 = vmatprep.mubr.msk.bf16.mxu0 %vm2151_vm0, %v2150_v1 }
 0x2cd   :  { %1806 = vmatprep.subr.bf16.mxu0 %v2150_v1 }
 0x2d0   :  { %1807 = vmatpush3.bf16.msra.mxu0 %v2250_v4 }
 0x2d1   :  { %1820 = vmatprep.subr.bf16.mxu0 %v2150_v1 }
 0x39e   :  { %v257_v37 = vpop.f32.mrb[4].mxu0 }
 0x39f   :  { %v264_v38 = vrot.slane %v257_v37, 6  ;;  %v1794_v39 = vpop.f32.mrb[5].mxu0 }
 0x3a0   :  { %v260_v40 = vpop.f32.mrb[6].mxu0 }
 0x3a1   :  { %v266_v41 = vadd.f32 %v264_v38, %v2281_v10  ;;  %v1795_v42 = vpop.f32.mrb[7].mxu0 }
 0x3a3   :  { %1960 = vtanh.f32 %v266_v41  ;;  %v1674_v44 = vmul.f32 -1.442695, %v266_v41 }
 0x3a5   :  { %1962 = vpow2.f32 %v1674_v44 }
 0x3ad   :  { %v1961_v43 = vpop.eup %1960 }
 0x3ae   :  { %279 = vrot.lane.b32.xlu1 %v1961_v43, %s2152_s19 }
 0x3af   :  { %v1963_v45 = vpop.eup %1962 }
 0x3b0   :  { %v270_v46 = vadd.f32 1.0, %v1963_v45 }
 0x3b2   :  { %1964 = vrcp.f32 %v270_v46 }
 0x3bc   :  { %v1965_v47 = vpop.eup %1964 }
 0x3bd   :  { %v277_v51 = vmul.f32 %v1965_v47, %v275_v50 }
 0x420   :  { %v280_v48 = vpop.permute.xlu1 %279 }
 0x421   :  { %v282_v49 = vmul.f32 %v1965_v47, %v280_v48 }
 0x423   :  { %284 = vrot.lane.b32.xlu0 %v282_v49, %s2152_s19 }
 0x495   :  { %v285_v52 = vpop.permute.xlu0 %284 }
 0x496   :  { %v287_v53 = vadd.f32 %v285_v52, %v277_v51 }
 0x498   :  { %1966 = vtanh.f32 %v287_v53  ;;  %v360_v13 = vrot.slane %v287_v53, 6 }
 0x4a2   :  { %v1967_v54 = vpop.eup %1966 }
 0x4a3   :  { %290 = vrot.lane.b32.xlu1 %v1967_v54, %s2152_s19 }
 0x515   :  { %v291_v55 = vpop.permute.xlu1 %290 }
 0x516   :  { %v2309_v56 = vmul.f32 %v1965_v47, %v291_v55 }
 0x518   :  { %v294_v57 = vpack.c.bf16 %v2309_v56, %v2309_v56 }
 0x51a   :  { %v302_v58 = vrot.slane %v294_v57, 1 }
 0x51c   :  { %303 = vrot.lane.b32.xlu0 %v302_v58, %s2153_s21 }
 0x58e   :  { %v304_v59 = vpop.permute.xlu0 %303 }
 0x58f   :  { %1801 = vmatmul.mubr.msk.bf16.vlgmr.msra.gmra.mrb[4].mxu1 %vm78_vm1, %v304_v59 }
 0x590   :  { %1813 = vmatpush3.bf16.msra.mxu1 %v2238_v2  ;;  %1816 = vmatprep.mubr.msk.bf16.mxu1 %vm2151_vm0, %v2150_v1 }
 0x591   :  { %1814 = vmatprep.subr.bf16.mxu1 %v2150_v1 }
 0x594   :  { %1815 = vmatpush3.bf16.msra.mxu1 %v2250_v4 }
 0x595   :  { %1828 = vmatprep.subr.bf16.mxu1 %v2150_v1 }
 0x662   :  { %v342_v60 = vpop.f32.mrb[4].mxu1 }
 0x663   :  { %v349_v61 = vrot.slane %v342_v60, 4  ;;  %v1802_v62 = vpop.f32.mrb[5].mxu1 }
 0x664   :  { %v345_v63 = vpop.f32.mrb[6].mxu1 }
 0x665   :  { %v351_v0 = vadd.f32 %v349_v61, %v2281_v10  ;;  %v1803_v3 = vpop.f32.mrb[7].mxu1 }
 0x667   :  { %1968 = vtanh.f32 %v351_v0  ;;  %v1676_v6 = vmul.f32 -1.442695, %v351_v0 }
 0x669   :  { %1970 = vpow2.f32 %v1676_v6 }
 0x671   :  { %v1969_v5 = vpop.eup %1968 }
 0x672   :  { %364 = vrot.lane.b32.xlu1 %v1969_v5, %s2152_s19 }
 0x673   :  { %v1971_v7 = vpop.eup %1970 }
 0x674   :  { %v355_v8 = vadd.f32 1.0, %v1971_v7 }
 0x676   :  { %1972 = vrcp.f32 %v355_v8 }
 0x680   :  { %v1973_v9 = vpop.eup %1972 }
 0x681   :  { %v362_v14 = vmul.f32 %v1973_v9, %v360_v13 }
 0x6e4   :  { %v365_v11 = vpop.permute.xlu1 %364 }
 0x6e5   :  { %v367_v12 = vmul.f32 %v1973_v9, %v365_v11 }
 0x6e7   :  { %369 = vrot.lane.b32.xlu0 %v367_v12, %s2152_s19 }
 0x759   :  { %v370_v15 = vpop.permute.xlu0 %369 }
 0x75a   :  { %v372_v17 = vadd.f32 %v370_v15, %v362_v14 }
 0x75c   :  { %1974 = vtanh.f32 %v372_v17  ;;  %v445_v38 = vrot.slane %v372_v17, 6 }
 0x766   :  { %v1975_v18 = vpop.eup %1974 }
 0x767   :  { %375 = vrot.lane.b32.xlu1 %v1975_v18, %s2152_s19 }
 0x7d9   :  { %v376_v19 = vpop.permute.xlu1 %375 }
 0x7da   :  { %v2325_v20 = vmul.f32 %v1973_v9, %v376_v19 }
 0x7dc   :  { %v379_v21 = vpack.c.bf16 %v2325_v20, %v2325_v20 }
 0x7de   :  { %v387_v22 = vrot.slane %v379_v21, 2 }
 0x7e0   :  { %388 = vrot.lane.b32.xlu0 %v387_v22, %s2153_s21 }
 0x852   :  { %v389_v23 = vpop.permute.xlu0 %388 }
 0x853   :  { %1809 = vmatmul.mubr.msk.bf16.vlgmr.msra.gmra.mrb[8].mxu0 %vm78_vm1, %v389_v23 }
 0x854   :  { %1821 = vmatpush3.bf16.msra.mxu0 %v2238_v2  ;;  %1824 = vmatprep.mubr.msk.bf16.mxu0 %vm2151_vm0, %v2150_v1 }
 0x855   :  { %1822 = vmatprep.subr.bf16.mxu0 %v2150_v1 }
 0x858   :  { %1823 = vmatpush3.bf16.msra.mxu0 %v2250_v4 }
 0x859   :  { %1836 = vmatprep.subr.bf16.mxu0 %v2150_v1 }
 0x926   :  { %v427_v24 = vpop.f32.mrb[8].mxu0 }
 0x927   :  { %v434_v25 = vrot.slane %v427_v24, 2  ;;  %v1810_v26 = vpop.f32.mrb[9].mxu0 }
 0x928   :  { %v430_v27 = vpop.f32.mrb[10].mxu0 }
 0x929   :  { %v436_v28 = vadd.f32 %v434_v25, %v2281_v10  ;;  %v1811_v29 = vpop.f32.mrb[11].mxu0 }
 0x92b   :  { %1976 = vtanh.f32 %v436_v28  ;;  %v1678_v31 = vmul.f32 -1.442695, %v436_v28 }
 0x92d   :  { %1978 = vpow2.f32 %v1678_v31 }
 0x935   :  { %v1977_v30 = vpop.eup %1976 }
 0x936   :  { %449 = vrot.lane.b32.xlu1 %v1977_v30, %s2152_s19 }
 0x937   :  { %v1979_v32 = vpop.eup %1978 }
 0x938   :  { %v440_v33 = vadd.f32 1.0, %v1979_v32 }
 0x93a   :  { %1980 = vrcp.f32 %v440_v33 }
 0x944   :  { %v1981_v35 = vpop.eup %1980 }
 0x945   :  { %v447_v39 = vmul.f32 %v1981_v35, %v445_v38 }
 0x9a8   :  { %v450_v36 = vpop.permute.xlu1 %449 }
 0x9a9   :  { %v452_v37 = vmul.f32 %v1981_v35, %v450_v36 }
 0x9ab   :  { %454 = vrot.lane.b32.xlu0 %v452_v37, %s2152_s19 }
 0xa1d   :  { %v455_v40 = vpop.permute.xlu0 %454 }
 0xa1e   :  { %v457_v41 = vadd.f32 %v455_v40, %v447_v39 }
 0xa20   :  { %1982 = vtanh.f32 %v457_v41  ;;  %v527_v60 = vrot.slane %v457_v41, 6 }
 0xa2a   :  { %v1983_v10 = vpop.eup %1982 }
 0xa2b   :  { %460 = vrot.lane.b32.xlu1 %v1983_v10, %s2152_s19 }
 0xa9d   :  { %v461_v42 = vpop.permute.xlu1 %460 }
 0xa9e   :  { %v2341_v43 = vmul.f32 %v1981_v35, %v461_v42 }
 0xaa0   :  { %v464_v44 = vpack.c.bf16 %v2341_v43, %v2341_v43 }
 0xaa2   :  { %v472_v45 = vrot.slane %v464_v44, 3 }
 0xaa4   :  { %473 = vrot.lane.b32.xlu0 %v472_v45, %s2153_s21 }
 0xb16   :  { %v474_v46 = vpop.permute.xlu0 %473 }
 0xb17   :  { %1817 = vmatmul.mubr.msk.bf16.vlgmr.msra.gmra.mrb[8].mxu1 %vm78_vm1, %v474_v46 }
 0xb18   :  { %1829 = vmatpush3.bf16.msra.mxu1 %v2238_v2  ;;  %1832 = vmatprep.mubr.msk.bf16.mxu1 %vm2151_vm0, %v2150_v1 }
 0xb19   :  { %1830 = vmatprep.subr.bf16.mxu1 %v2150_v1 }
 0xb1c   :  { %1831 = vmatpush3.bf16.msra.mxu1 %v2250_v4 }
 0xb1d   :  { %1844 = vmatprep.subr.bf16.mxu1 %v2150_v1 }
 0xbea   :  { %v512_v47 = vpop.f32.mrb[8].mxu1 }
 0xbeb   :  { %v518_v48 = vadd.f32 %v512_v47, %v2284_v16  ;;  %v1818_v49 = vpop.f32.mrb[9].mxu1 }
 0xbec   :  { %v515_v50 = vpop.f32.mrb[10].mxu1 }
 0xbed   :  { %1984 = vtanh.f32 %v518_v48  ;;  %v1819_v51 = vpop.f32.mrb[11].mxu1  ;;  %v1680_v53 = vmul.f32 -1.442695, %v518_v48 }
 0xbef   :  { %1986 = vpow2.f32 %v1680_v53 }
 0xbf7   :  { %v1985_v52 = vpop.eup %1984 }
 0xbf8   :  { %531 = vrot.lane.b32.xlu1 %v1985_v52, %s2152_s19 }
 0xbf9   :  { %v1987_v54 = vpop.eup %1986 }
 0xbfa   :  { %v522_v55 = vadd.f32 1.0, %v1987_v54 }
 0xbfc   :  { %1988 = vrcp.f32 %v522_v55 }
 0xc06   :  { %v1989_v57 = vpop.eup %1988 }
 0xc07   :  { %v529_v61 = vmul.f32 %v1989_v57, %v527_v60 }
 0xc6a   :  { %v532_v58 = vpop.permute.xlu1 %531 }
 0xc6b   :  { %v534_v59 = vmul.f32 %v1989_v57, %v532_v58 }
 0xc6d   :  { %536 = vrot.lane.b32.xlu0 %v534_v59, %s2152_s19 }
 0xcdf   :  { %v537_v62 = vpop.permute.xlu0 %536 }
 0xce0   :  { %v539_v63 = vadd.f32 %v537_v62, %v529_v61 }
 0xce2   :  { %1990 = vtanh.f32 %v539_v63  ;;  %v610_v22 = vrot.slane %v539_v63, 6 }
 0xcec   :  { %v1991_v0 = vpop.eup %1990 }
 0xced   :  { %542 = vrot.lane.b32.xlu1 %v1991_v0, %s2152_s19 }
 0xd5f   :  { %v543_v3 = vpop.permute.xlu1 %542 }
 0xd60   :  { %v2357_v5 = vmul.f32 %v1989_v57, %v543_v3 }
 0xd62   :  { %v546_v6 = vpack.c.bf16 %v2357_v5, %v2357_v5 }
 0xd64   :  { %553 = vrot.lane.b32.xlu0 %v546_v6, %s2153_s21 }
 0xdd6   :  { %v554_v7 = vpop.permute.xlu0 %553 }
 0xdd7   :  { %1825 = vmatmul.mubr.msk.bf16.vlgmr.msra.gmra.mrb[12].mxu0 %vm78_vm1, %v554_v7 }
 0xdd8   :  { %1837 = vmatpush3.bf16.msra.mxu0 %v2238_v2  ;;  %1840 = vmatprep.mubr.msk.bf16.mxu0 %vm2151_vm0, %v2150_v1 }
 0xdd9   :  { %1838 = vmatprep.subr.bf16.mxu0 %v2150_v1 }
 0xddc   :  { %1839 = vmatpush3.bf16.msra.mxu0 %v2250_v4 }
 0xddd   :  { %1852 = vmatprep.subr.bf16.mxu0 %v2150_v1 }
 0xeaa   :  { %v592_v8 = vpop.f32.mrb[12].mxu0 }
 0xeab   :  { %v599_v9 = vrot.slane %v592_v8, 6  ;;  %v1826_v11 = vpop.f32.mrb[13].mxu0 }
 0xeac   :  { %v595_v12 = vpop.f32.mrb[14].mxu0 }
 0xead   :  { %v601_v13 = vadd.f32 %v599_v9, %v2284_v16  ;;  %v1827_v14 = vpop.f32.mrb[15].mxu0 }
 0xeaf   :  { %1992 = vtanh.f32 %v601_v13  ;;  %v1682_v2 = vmul.f32 -1.442695, %v601_v13 }
 0xeb1   :  { %1994 = vpow2.f32 %v1682_v2  ;;  %v1948_v2 = vld [vmem:[%s2607_s6] sm:$0xff]  }
 0xeb9   :  { %v1993_v15 = vpop.eup %1992 }
 0xeba   :  { %614 = vrot.lane.b32.xlu1 %v1993_v15, %s2152_s19 }
 0xebb   :  { %v1995_v17 = vpop.eup %1994 }
 0xebc   :  { %v605_v18 = vadd.f32 1.0, %v1995_v17  ;;  %v2415_v17 = vld [vmem:[%s2608_s7] sm:$0xff]  }
 0xebe   :  { %1996 = vrcp.f32 %v605_v18  ;;  %v1691_v18 = vld [vmem:[%s2602_s1 + $0x2] sm:$0x3] }
 0xec8   :  { %v1997_v19 = vpop.eup %1996 }
 0xec9   :  { %v612_v23 = vmul.f32 %v1997_v19, %v610_v22 }
 0xf2c   :  { %v615_v4 = vpop.permute.xlu1 %614 }
 0xf2d   :  { %v617_v21 = vmul.f32 %v1997_v19, %v615_v4 }
 0xf2f   :  { %619 = vrot.lane.b32.xlu0 %v617_v21, %s2152_s19 }
 0xfa1   :  { %v620_v24 = vpop.permute.xlu0 %619 }
 0xfa2   :  { %v622_v25 = vadd.f32 %v620_v24, %v612_v23  ;;  %v1692_v23 = vld [vmem:[%s2603_s2 + $0x2] sm:$0x3] }
 0xfa4   :  { %1998 = vtanh.f32 %v622_v25  ;;  %v694_v46 = vrot.slane %v622_v25, 6 }
 0xfae   :  { %v1999_v26 = vpop.eup %1998 }
 0xfaf   :  { %625 = vrot.lane.b32.xlu1 %v1999_v26, %s2152_s19 }
0x1021   :  { %v626_v27 = vpop.permute.xlu1 %625 }
0x1022   :  { %v2373_v28 = vmul.f32 %v1997_v19, %v626_v27  ;;  %v886_v19 = vpack.c.bf16 %v1691_v18, %v1691_v18 }
0x1024   :  { %v629_v29 = vpack.c.bf16 %v2373_v28, %v2373_v28 }
0x1026   :  { %v636_v30 = vrot.slane %v629_v29, 1 }
0x1028   :  { %637 = vrot.lane.b32.xlu0 %v636_v30, %s2153_s21 }
0x109a   :  { %v638_v31 = vpop.permute.xlu0 %637 }
0x109b   :  { %1833 = vmatmul.mubr.msk.bf16.vlgmr.msra.gmra.mrb[12].mxu1 %vm78_vm1, %v638_v31 }
0x109c   :  { %1848 = vmatprep.mubr.msk.bf16.mxu1 %vm2151_vm0, %v2150_v1  ;;  %1845 = vmatpush3.bf16.msra.mxu1 %v1948_v2 }
0x109d   :  { %1846 = vmatprep.subr.bf16.mxu1 %v2150_v1 }
0x116e   :  { %v676_v32 = vpop.f32.mrb[12].mxu1 }
0x116f   :  { %v683_v33 = vrot.slane %v676_v32, 4  ;;  %v1834_v35 = vpop.f32.mrb[13].mxu1 }
0x1170   :  { %v679_v36 = vpop.f32.mrb[14].mxu1  ;;  %v1687_v35 = vld [vmem:[%s2609_s8] ss:$0 sm:$0xff] }
0x1171   :  { %v685_v37 = vadd.f32 %v683_v33, %v2284_v16  ;;  %v1835_v38 = vpop.f32.mrb[15].mxu1 }
0x1173   :  { %2000 = vtanh.f32 %v685_v37  ;;  %v1684_v40 = vmul.f32 -1.442695, %v685_v37 }
0x1175   :  { %2002 = vpow2.f32 %v1684_v40 }
0x117d   :  { %v2001_v39 = vpop.eup %2000 }
0x117e   :  { %698 = vrot.lane.b32.xlu1 %v2001_v39, %s2152_s19 }
0x117f   :  { %v2003_v41 = vpop.eup %2002 }
0x1180   :  { %v689_v10 = vadd.f32 1.0, %v2003_v41 }
0x1182   :  { %2004 = vrcp.f32 %v689_v10 }
0x118c   :  { %v2005_v42 = vpop.eup %2004 }
0x118d   :  { %v696_v47 = vmul.f32 %v2005_v42, %v694_v46 }
0x11f0   :  { %v699_v44 = vpop.permute.xlu1 %698 }
0x11f1   :  { %v701_v45 = vmul.f32 %v2005_v42, %v699_v44 }
0x11f3   :  { %703 = vrot.lane.b32.xlu0 %v701_v45, %s2152_s19 }
0x1265   :  { %v704_v48 = vpop.permute.xlu0 %703 }
0x1266   :  { %v706_v49 = vadd.f32 %v704_v48, %v696_v47 }
0x1268   :  { %2006 = vtanh.f32 %v706_v49 }
0x1272   :  { %v2007_v50 = vpop.eup %2006 }
0x1273   :  { %709 = vrot.lane.b32.xlu1 %v2007_v50, %s2152_s19 }
0x12e5   :  { %v710_v51 = vpop.permute.xlu1 %709 }
0x12e6   :  { %v712_v52 = vmul.f32 %v2005_v42, %v710_v51 }
0x12e8   :  { %v713_v53 = vpack.c.bf16 %v712_v52, %v712_v52 }
0x12ea   :  { %v720_v54 = vrot.slane %v713_v53, 2 }
0x12ec   :  { %721 = vrot.lane.b32.xlu0 %v720_v54, %s2153_s21 }
0x135e   :  { %v722_v55 = vpop.permute.xlu0 %721 }
0x135f   :  { %1841 = vmatmul.mubr.msk.bf16.vlgmr.msra.gmra.mrb[16].mxu0 %vm78_vm1, %v722_v55 }
0x1360   :  { %1856 = vmatprep.mubr.msk.bf16.mxu0 %vm2151_vm0, %v2150_v1  ;;  %1853 = vmatpush3.bf16.msra.mxu0 %v2415_v17 }
0x1361   :  { %1854 = vmatprep.subr.bf16.mxu0 %v2150_v1 }
0x1432   :  { %v760_v57 = vpop.f32.mrb[16].mxu0 }
0x1433   :  { %v767_v58 = vrot.slane %v760_v57, 2  ;;  %v1842_v59 = vpop.f32.mrb[17].mxu0 }
0x1434   :  { %v763_v60 = vpop.f32.mrb[18].mxu0 }
0x1435   :  { %v769_v61 = vadd.f32 %v767_v58, %v2284_v16  ;;  %v1843_v62 = vpop.f32.mrb[19].mxu0  ;;  %v778_v16 = vrot.slane %v706_v49, 6 }
0x1437   :  { %2008 = vtanh.f32 %v769_v61  ;;  %v1686_v0 = vmul.f32 -1.442695, %v769_v61 }
0x1439   :  { %2010 = vpow2.f32 %v1686_v0 }
0x1441   :  { %v2009_v63 = vpop.eup %2008 }
0x1442   :  { %782 = vrot.lane.b32.xlu1 %v2009_v63, %s2152_s19 }
0x1443   :  { %v2011_v3 = vpop.eup %2010 }
0x1444   :  { %v773_v6 = vadd.f32 1.0, %v2011_v3 }
0x1446   :  { %2012 = vrcp.f32 %v773_v6 }
0x1450   :  { %v2013_v7 = vpop.eup %2012 }
0x1451   :  { %v780_v11 = vmul.f32 %v2013_v7, %v778_v16 }
0x14b4   :  { %v783_v8 = vpop.permute.xlu1 %782 }
0x14b5   :  { %v785_v9 = vmul.f32 %v2013_v7, %v783_v8 }
0x14b7   :  { %787 = vrot.lane.b32.xlu0 %v785_v9, %s2152_s19 }
0x14bb   :  { %212 = vrot.lane.b32.xlu0 %v2293_v34, %s2153_s21 }
0x14bf   :  { %381 = vrot.lane.b32.xlu0 %v2325_v20, %s2153_s21 }
0x14c3   :  { %548 = vrot.lane.b32.xlu0 %v2357_v5, %s2153_s21 }
0x14c7   :  { %715 = vrot.lane.b32.xlu0 %v712_v52, %s2153_s21 }
0x1529   :  { %v788_v12 = vpop.permute.xlu0 %787 }
0x152a   :  { %v2399_v13 = vadd.f32 %v788_v12, %v780_v11 }
0x152c   :  { %2014 = vtanh.f32 %v2399_v13 }
0x152d   :  { %v213_v14 = vpop.permute.xlu0 %212 }
0x152e   :  { %216 = vst.msk [vmem:[#allocation2] sm:$0x3] %vm215_vm2, %v213_v14 }
0x1531   :  { %v382_v34 = vpop.permute.xlu0 %381 }
0x1532   :  { %385 = vst.msk [vmem:[#allocation2] sm:$0x30] %vm384_vm3, %v382_v34 }
0x1535   :  { %v549_v15 = vpop.permute.xlu0 %548 }
0x1536   :  { %v2015_v20 = vpop.eup %2014  ;;  %551 = vst.msk [vmem:[#allocation2 + $0x8] sm:$0x3] %vm215_vm2, %v549_v15 }
0x1537   :  { %793 = vrot.lane.b32.xlu1 %v2015_v20, %s2152_s19 }
0x1539   :  { %v716_v5 = vpop.permute.xlu0 %715 }
0x153a   :  { %718 = vst.msk [vmem:[#allocation2 + $0x8] sm:$0x30] %vm384_vm3, %v716_v5 }
0x153b   :  { %296 = vrot.lane.b32.xlu1 %v2309_v56, %s2153_s21  ;;  %v1950_v56 = vld [vmem:[%s2607_s6 + $0x8] sm:$0xff]  }
0x153c   :  { %1847 = vmatpush3.bf16.msra.mxu1 %v1950_v56 }
0x153d   :  { %1860 = vmatprep.subr.bf16.mxu1 %v2150_v1 }
0x153f   :  { %466 = vrot.lane.b32.xlu1 %v2341_v43, %s2153_s21  ;;  %v2424_v43 = vld [vmem:[%s2608_s7 + $0x8] sm:$0xff]  }
0x1540   :  { %1855 = vmatpush3.bf16.msra.mxu0 %v2424_v43 }
0x1541   :  { %1868 = vmatprep.subr.bf16.mxu0 %v2150_v1 }
0x1543   :  { %631 = vrot.lane.b32.xlu1 %v2373_v28, %s2153_s21  ;;  %1857 = vmatmul.mubr.msk.bf16.vlgmr.msra.gmra.mrb[20].mxu0 %vm78_vm1, %v886_v19 }
0x1544   :  { %1869 = vmatpush3.bf16.msra.mxu0 %v2415_v17  ;;  %1872 = vmatprep.mubr.msk.bf16.mxu0 %vm2151_vm0, %v2150_v1 }
0x1545   :  { %1870 = vmatprep.subr.bf16.mxu0 %v2150_v1 }
0x1548   :  { %1871 = vmatpush3.bf16.msra.mxu0 %v2424_v43 }
0x1549   :  { %1884 = vmatprep.subr.bf16.mxu0 %v2150_v1 }
0x15a9   :  { %v794_v4 = vpop.permute.xlu1 %793 }
0x15aa   :  { %v796_v21 = vmul.f32 %v2013_v7, %v794_v4 }
0x15ac   :  { %798 = vrot.lane.b32.xlu1 %v796_v21, %s2153_s21 }
0x15ad   :  { %v297_v22 = vpop.permute.xlu1 %296 }
0x15ae   :  { %300 = vst.msk [vmem:[#allocation2] sm:$0xc] %vm299_vm4, %v297_v22 }
0x15b0   :  { %951 = vrot.lane.b32.xlu1 %v1692_v23, %s2152_s19 }
0x15b1   :  { %v467_v24 = vpop.permute.xlu1 %466 }
0x15b2   :  { %470 = vst.msk [vmem:[#allocation2] sm:$0xc0] %vm469_vm5, %v467_v24 }
0x15b5   :  { %v632_v25 = vpop.permute.xlu1 %631 }
0x15b6   :  { %634 = vst.msk [vmem:[#allocation2 + $0x8] sm:$0xc] %vm299_vm4, %v632_v25 }
0x15b9   :  { %v817_v27 = vld [vmem:[#allocation2] sm:$0xff] }
0x1616   :  { %v936_v30 = vpop.f32.mrb[20].mxu0 }
0x1617   :  { %v1858_v31 = vpop.f32.mrb[21].mxu0 }
0x1618   :  { %v939_v32 = vpop.f32.mrb[22].mxu0 }
0x1619   :  { %v1859_v33 = vpop.f32.mrb[23].mxu0 }
0x161e   :  { %v799_v26 = vpop.permute.xlu1 %798 }
0x161f   :  { %801 = vst.msk [vmem:[#allocation2 + $0x8] sm:$0xc0] %vm469_vm5, %v799_v26  ;;  %802 = vst.msk [vmem:[#allocation5 - $0x6] sm:$0xc0] %vm469_vm5, %v799_v26 }
0x1622   :  { %v952_v50 = vpop.permute.xlu1 %951 }
0x1626   :  { %v818_v28 = vld [vmem:[#allocation2 + $0x8] sm:$0xff] }
0x1627   :  { %v819_v29 = vpack.c.bf16 %v818_v28, %v817_v27 }
0x1629   :  { %1849 = vmatmul.mubr.msk.bf16.vlgmr.msra.gmra.mrb[16].mxu1 %vm78_vm1, %v819_v29 }
0x162a   :  { %1861 = vmatpush3.bf16.msra.mxu1 %v2415_v17  ;;  %1864 = vmatprep.mubr.msk.bf16.mxu1 %vm2151_vm0, %v2150_v1 }
0x162b   :  { %1862 = vmatprep.subr.bf16.mxu1 %v2150_v1 }
0x162e   :  { %1863 = vmatpush3.bf16.msra.mxu1 %v2424_v43 }
0x162f   :  { %1876 = vmatprep.subr.bf16.mxu1 %v2150_v1 }
0x16fc   :  { %v875_v36 = vpop.f32.mrb[16].mxu1 }
0x16fd   :  { %v2459_v37 = vadd.f32 %v1687_v35, %v875_v36  ;;  %v1850_v38 = vpop.f32.mrb[17].mxu1 }
0x16fe   :  { %v878_v39 = vpop.f32.mrb[18].mxu1 }
0x16ff   :  { %v942_v40 = vadd.f32 %v936_v30, %v2459_v37  ;;  %v2462_v41 = vadd.f32 %v1687_v35, %v878_v39  ;;  %v1851_v10 = vpop.f32.mrb[19].mxu1 }
0x1701   :  { %2016 = vtanh.f32 %v942_v40  ;;  %v1696_v44 = vmul.f32 -1.442695, %v942_v40 }
0x1703   :  { %2018 = vpow2.f32 %v1696_v44 }
0x170b   :  { %v2017_v42 = vpop.eup %2016 }
0x170c   :  { %956 = vrot.lane.b32.xlu0 %v2017_v42, %s2152_s19 }
0x170d   :  { %v2019_v45 = vpop.eup %2018 }
0x170e   :  { %v946_v46 = vadd.f32 1.0, %v2019_v45 }
0x1710   :  { %2020 = vrcp.f32 %v946_v46 }
0x171a   :  { %v2021_v47 = vpop.eup %2020 }
0x171b   :  { %v954_v51 = vmul.f32 %v2021_v47, %v952_v50 }
0x177e   :  { %v957_v48 = vpop.permute.xlu0 %956 }
0x177f   :  { %v959_v49 = vmul.f32 %v2021_v47, %v957_v48 }
0x1781   :  { %961 = vrot.lane.b32.xlu0 %v959_v49, %s2152_s19 }
0x17f3   :  { %v962_v52 = vpop.permute.xlu0 %961 }
0x17f4   :  { %v964_v53 = vadd.f32 %v962_v52, %v954_v51 }
0x17f6   :  { %2022 = vtanh.f32 %v964_v53  ;;  %v1030_v14 = vrot.slane %v964_v53, 6 }
0x1800   :  { %v2023_v54 = vpop.eup %2022 }
0x1801   :  { %967 = vrot.lane.b32.xlu1 %v2023_v54, %s2152_s19 }
0x1873   :  { %v968_v55 = vpop.permute.xlu1 %967 }
0x1874   :  { %v970_v57 = vmul.f32 %v2021_v47, %v968_v55 }
0x1876   :  { %v971_v58 = vpack.c.bf16 %v970_v57, %v970_v57 }
0x1878   :  { %973 = vrot.lane.b32.xlu0 %v971_v58, %s2153_s21 }
0x18ea   :  { %v974_v59 = vpop.permute.xlu0 %973 }
0x18eb   :  { %1865 = vmatmul.mubr.msk.bf16.vlgmr.msra.gmra.mrb[20].mxu1 %vm78_vm1, %v974_v59 }
0x18ec   :  { %1877 = vmatpush3.bf16.msra.mxu1 %v2415_v17  ;;  %1880 = vmatprep.mubr.msk.bf16.mxu1 %vm2151_vm0, %v2150_v1 }
0x18ed   :  { %1878 = vmatprep.subr.bf16.mxu1 %v2150_v1 }
0x18f0   :  { %1879 = vmatpush3.bf16.msra.mxu1 %v2424_v43 }
0x18f1   :  { %1892 = vmatprep.subr.bf16.mxu1 %v2150_v1 }
0x19be   :  { %v1012_v60 = vpop.f32.mrb[20].mxu1 }
0x19bf   :  { %v1019_v61 = vrot.slane %v1012_v60, 6  ;;  %v1866_v62 = vpop.f32.mrb[21].mxu1 }
0x19c0   :  { %v1015_v63 = vpop.f32.mrb[22].mxu1 }
0x19c1   :  { %v1021_v0 = vadd.f32 %v1019_v61, %v2459_v37  ;;  %v1867_v3 = vpop.f32.mrb[23].mxu1 }
0x19c3   :  { %2024 = vtanh.f32 %v1021_v0  ;;  %v1698_v7 = vmul.f32 -1.442695, %v1021_v0 }
0x19c5   :  { %2026 = vpow2.f32 %v1698_v7 }
0x19cd   :  { %v2025_v6 = vpop.eup %2024 }
0x19ce   :  { %1034 = vrot.lane.b32.xlu1 %v2025_v6, %s2152_s19 }
0x19cf   :  { %v2027_v8 = vpop.eup %2026 }
0x19d0   :  { %v1025_v9 = vadd.f32 1.0, %v2027_v8 }
0x19d2   :  { %2028 = vrcp.f32 %v1025_v9 }
0x19dc   :  { %v2029_v16 = vpop.eup %2028 }
0x19dd   :  { %v1032_v34 = vmul.f32 %v2029_v16, %v1030_v14 }
0x1a40   :  { %v1035_v11 = vpop.permute.xlu1 %1034 }
0x1a41   :  { %v1037_v12 = vmul.f32 %v2029_v16, %v1035_v11 }
0x1a43   :  { %1039 = vrot.lane.b32.xlu0 %v1037_v12, %s2152_s19 }
0x1ab5   :  { %v1040_v15 = vpop.permute.xlu0 %1039 }
0x1ab6   :  { %v1042_v20 = vadd.f32 %v1040_v15, %v1032_v34 }
0x1ab8   :  { %2030 = vtanh.f32 %v1042_v20  ;;  %v1109_v35 = vrot.slane %v1042_v20, 6 }
0x1ac2   :  { %v2031_v5 = vpop.eup %2030 }
0x1ac3   :  { %1045 = vrot.lane.b32.xlu1 %v2031_v5, %s2152_s19 }
0x1b35   :  { %v1046_v2 = vpop.permute.xlu1 %1045 }
0x1b36   :  { %v1048_v56 = vmul.f32 %v2029_v16, %v1046_v2 }
0x1b38   :  { %v1049_v18 = vpack.c.bf16 %v1048_v56, %v1048_v56 }
0x1b3a   :  { %v1051_v19 = vrot.slane %v1049_v18, 1 }
0x1b3c   :  { %1052 = vrot.lane.b32.xlu0 %v1051_v19, %s2153_s21 }
0x1bae   :  { %v1053_v4 = vpop.permute.xlu0 %1052 }
0x1baf   :  { %1873 = vmatmul.mubr.msk.bf16.vlgmr.msra.gmra.mrb[24].mxu0 %vm78_vm1, %v1053_v4 }
0x1bb0   :  { %1885 = vmatpush3.bf16.msra.mxu0 %v2415_v17  ;;  %1888 = vmatprep.mubr.msk.bf16.mxu0 %vm2151_vm0, %v2150_v1 }
0x1bb1   :  { %1886 = vmatprep.subr.bf16.mxu0 %v2150_v1 }
0x1bb4   :  { %1887 = vmatpush3.bf16.msra.mxu0 %v2424_v43 }
0x1bb5   :  { %1900 = vmatprep.subr.bf16.mxu0 %v2150_v1 }
0x1c82   :  { %v1091_v21 = vpop.f32.mrb[24].mxu0 }
0x1c83   :  { %v1098_v22 = vrot.slane %v1091_v21, 4  ;;  %v1874_v23 = vpop.f32.mrb[25].mxu0 }
0x1c84   :  { %v1094_v24 = vpop.f32.mrb[26].mxu0 }
0x1c85   :  { %v1100_v25 = vadd.f32 %v1098_v22, %v2459_v37  ;;  %v1875_v26 = vpop.f32.mrb[27].mxu0 }
0x1c87   :  { %2032 = vtanh.f32 %v1100_v25  ;;  %v1700_v28 = vmul.f32 -1.442695, %v1100_v25 }
0x1c89   :  { %2034 = vpow2.f32 %v1700_v28 }
0x1c91   :  { %v2033_v27 = vpop.eup %2032 }
0x1c92   :  { %1113 = vrot.lane.b32.xlu1 %v2033_v27, %s2152_s19 }
0x1c93   :  { %v2035_v29 = vpop.eup %2034 }
0x1c94   :  { %v1104_v30 = vadd.f32 1.0, %v2035_v29 }
0x1c96   :  { %2036 = vrcp.f32 %v1104_v30 }
0x1ca0   :  { %v2037_v31 = vpop.eup %2036 }
0x1ca1   :  { %v1111_v36 = vmul.f32 %v2037_v31, %v1109_v35 }
0x1d04   :  { %v1114_v32 = vpop.permute.xlu1 %1113 }
0x1d05   :  { %v1116_v33 = vmul.f32 %v2037_v31, %v1114_v32 }
0x1d07   :  { %1118 = vrot.lane.b32.xlu0 %v1116_v33, %s2152_s19 }
0x1d79   :  { %v1119_v38 = vpop.permute.xlu0 %1118 }
0x1d7a   :  { %v1121_v39 = vadd.f32 %v1119_v38, %v1111_v36 }
0x1d7c   :  { %2038 = vtanh.f32 %v1121_v39  ;;  %v1188_v61 = vrot.slane %v1121_v39, 6 }
0x1d86   :  { %v2039_v40 = vpop.eup %2038 }
0x1d87   :  { %1124 = vrot.lane.b32.xlu1 %v2039_v40, %s2152_s19 }
0x1df9   :  { %v1125_v10 = vpop.permute.xlu1 %1124 }
0x1dfa   :  { %v1127_v42 = vmul.f32 %v2037_v31, %v1125_v10 }
0x1dfc   :  { %v1128_v44 = vpack.c.bf16 %v1127_v42, %v1127_v42 }
0x1dfe   :  { %v1130_v45 = vrot.slane %v1128_v44, 2 }
0x1e00   :  { %1131 = vrot.lane.b32.xlu0 %v1130_v45, %s2153_s21 }
0x1e72   :  { %v1132_v46 = vpop.permute.xlu0 %1131 }
0x1e73   :  { %1881 = vmatmul.mubr.msk.bf16.vlgmr.msra.gmra.mrb[24].mxu1 %vm78_vm1, %v1132_v46 }
0x1e74   :  { %1893 = vmatpush3.bf16.msra.mxu1 %v2415_v17  ;;  %1896 = vmatprep.mubr.msk.bf16.mxu1 %vm2151_vm0, %v2150_v1 }
0x1e75   :  { %1894 = vmatprep.subr.bf16.mxu1 %v2150_v1 }
0x1e78   :  { %1895 = vmatpush3.bf16.msra.mxu1 %v2424_v43 }
0x1e79   :  { %1908 = vmatprep.subr.bf16.mxu1 %v2150_v1 }
0x1f46   :  { %v1170_v47 = vpop.f32.mrb[24].mxu1 }
0x1f47   :  { %v1177_v48 = vrot.slane %v1170_v47, 2  ;;  %v1882_v49 = vpop.f32.mrb[25].mxu1 }
0x1f48   :  { %v1173_v50 = vpop.f32.mrb[26].mxu1 }
0x1f49   :  { %v1179_v51 = vadd.f32 %v1177_v48, %v2459_v37  ;;  %v1883_v52 = vpop.f32.mrb[27].mxu1 }
0x1f4b   :  { %2040 = vtanh.f32 %v1179_v51  ;;  %v1702_v54 = vmul.f32 -1.442695, %v1179_v51 }
0x1f4d   :  { %2042 = vpow2.f32 %v1702_v54 }
0x1f55   :  { %v2041_v53 = vpop.eup %2040 }
0x1f56   :  { %1192 = vrot.lane.b32.xlu1 %v2041_v53, %s2152_s19 }
0x1f57   :  { %v2043_v55 = vpop.eup %2042 }
0x1f58   :  { %v1183_v57 = vadd.f32 1.0, %v2043_v55 }
0x1f5a   :  { %2044 = vrcp.f32 %v1183_v57 }
0x1f64   :  { %v2045_v58 = vpop.eup %2044 }
0x1f65   :  { %v1190_v62 = vmul.f32 %v2045_v58, %v1188_v61 }
0x1fc8   :  { %v1193_v59 = vpop.permute.xlu1 %1192 }
0x1fc9   :  { %v1195_v60 = vmul.f32 %v2045_v58, %v1193_v59 }
0x1fcb   :  { %1197 = vrot.lane.b32.xlu0 %v1195_v60, %s2152_s19 }
0x203d   :  { %v1198_v63 = vpop.permute.xlu0 %1197 }
0x203e   :  { %v1200_v0 = vadd.f32 %v1198_v63, %v1190_v62 }
0x2040   :  { %2046 = vtanh.f32 %v1200_v0  ;;  %v1264_v4 = vrot.slane %v1200_v0, 6 }
0x204a   :  { %v2047_v37 = vpop.eup %2046 }
0x204b   :  { %1203 = vrot.lane.b32.xlu1 %v2047_v37, %s2152_s19 }
0x20bd   :  { %v1204_v3 = vpop.permute.xlu1 %1203 }
0x20be   :  { %v1206_v6 = vmul.f32 %v2045_v58, %v1204_v3 }
0x20c0   :  { %v1207_v7 = vpack.c.bf16 %v1206_v6, %v1206_v6 }
0x20c2   :  { %v1209_v8 = vrot.slane %v1207_v7, 3 }
0x20c4   :  { %1210 = vrot.lane.b32.xlu0 %v1209_v8, %s2153_s21 }
0x2136   :  { %v1211_v9 = vpop.permute.xlu0 %1210 }
0x2137   :  { %1889 = vmatmul.mubr.msk.bf16.vlgmr.msra.gmra.mrb[28].mxu0 %vm78_vm1, %v1211_v9 }
0x2138   :  { %1901 = vmatpush3.bf16.msra.mxu0 %v2415_v17  ;;  %1904 = vmatprep.mubr.msk.bf16.mxu0 %vm2151_vm0, %v2150_v1 }
0x2139   :  { %1902 = vmatprep.subr.bf16.mxu0 %v2150_v1 }
0x213c   :  { %1903 = vmatpush3.bf16.msra.mxu0 %v2424_v43 }
0x220a   :  { %v1249_v16 = vpop.f32.mrb[28].mxu0 }
0x220b   :  { %v1255_v11 = vadd.f32 %v1249_v16, %v2462_v41  ;;  %v1890_v12 = vpop.f32.mrb[29].mxu0 }
0x220c   :  { %v1252_v14 = vpop.f32.mrb[30].mxu0 }
0x220d   :  { %2048 = vtanh.f32 %v1255_v11  ;;  %v1891_v34 = vpop.f32.mrb[31].mxu0  ;;  %v1704_v20 = vmul.f32 -1.442695, %v1255_v11 }
0x220f   :  { %2050 = vpow2.f32 %v1704_v20 }
0x2217   :  { %v2049_v15 = vpop.eup %2048 }
0x2218   :  { %1268 = vrot.lane.b32.xlu1 %v2049_v15, %s2152_s19 }
0x2219   :  { %v2051_v5 = vpop.eup %2050 }
0x221a   :  { %v1259_v2 = vadd.f32 1.0, %v2051_v5 }
0x221c   :  { %2052 = vrcp.f32 %v1259_v2 }
0x2226   :  { %v2053_v56 = vpop.eup %2052 }
0x2227   :  { %v1266_v21 = vmul.f32 %v2053_v56, %v1264_v4 }
0x228a   :  { %v1269_v18 = vpop.permute.xlu1 %1268 }
0x228b   :  { %v1271_v19 = vmul.f32 %v2053_v56, %v1269_v18 }
0x228d   :  { %1273 = vrot.lane.b32.xlu0 %v1271_v19, %s2152_s19 }
0x22ff   :  { %v1274_v22 = vpop.permute.xlu0 %1273 }
0x2300   :  { %v1276_v23 = vadd.f32 %v1274_v22, %v1266_v21 }
0x2302   :  { %2054 = vtanh.f32 %v1276_v23 }
0x230c   :  { %v2055_v24 = vpop.eup %2054 }
0x230d   :  { %1279 = vrot.lane.b32.xlu1 %v2055_v24, %s2152_s19 }
0x237f   :  { %v1280_v25 = vpop.permute.xlu1 %1279 }
0x2380   :  { %v1282_v26 = vmul.f32 %v2053_v56, %v1280_v25 }
0x2382   :  { %v1283_v27 = vpack.c.bf16 %v1282_v26, %v1282_v26 }
0x2384   :  { %1285 = vrot.lane.b32.xlu0 %v1283_v27, %s2153_s21 }
0x23f6   :  { %v1286_v28 = vpop.permute.xlu0 %1285 }
0x23f7   :  { %1897 = vmatmul.mubr.msk.bf16.vlgmr.msra.gmra.mrb[28].mxu1 %vm78_vm1, %v1286_v28 }
0x23f8   :  { %1909 = vmatpush3.bf16.msra.mxu1 %v2415_v17  ;;  %1912 = vmatprep.mubr.msk.bf16.mxu1 %vm2151_vm0, %v2150_v1 }
0x23f9   :  { %1910 = vmatprep.subr.bf16.mxu1 %v2150_v1 }
0x23fc   :  { %1911 = vmatpush3.bf16.msra.mxu1 %v2424_v43  ;;  %v1342_v43 = vrot.slane %v1276_v23, 6 }
0x24ca   :  { %v1324_v29 = vpop.f32.mrb[28].mxu1 }
0x24cb   :  { %v1331_v30 = vrot.slane %v1324_v29, 6  ;;  %v1898_v31 = vpop.f32.mrb[29].mxu1 }
0x24cc   :  { %v1327_v32 = vpop.f32.mrb[30].mxu1  ;;  %v1533_v31 = vld [vmem:[%s2610_s9 + $0x10] sm:$0xff] }
0x24cd   :  { %v1333_v33 = vadd.f32 %v1331_v30, %v2462_v41  ;;  %v1899_v35 = vpop.f32.mrb[31].mxu1  ;;  %v1532_v30 = vld [vmem:[%s2610_s9 + $0x8] sm:$0xff]  ;;  %v2154_v32 = vmov 0.0|0.0  }
0x24ce   :  { %1927 = vmatprep.subr.bf16.mxu0 %v2154_v32  ;;  %v1534_v35 = vld [vmem:[%s2610_s9 + $0x18] sm:$0xff] }
0x24cf   :  { %2056 = vtanh.f32 %v1333_v33  ;;  %v1706_v38 = vmul.f32 -1.442695, %v1333_v33 }
0x24d1   :  { %2058 = vpow2.f32 %v1706_v38 }
0x24d9   :  { %v2057_v36 = vpop.eup %2056 }
0x24da   :  { %1346 = vrot.lane.b32.xlu1 %v2057_v36, %s2152_s19  ;;  %v1931_v36 = vpack.c.bf16 %v1534_v35, %v1533_v31 }
0x24db   :  { %v2059_v17 = vpop.eup %2058 }
0x24dc   :  { %v1337_v39 = vadd.f32 1.0, %v2059_v17 }
0x24de   :  { %2060 = vrcp.f32 %v1337_v39 }
0x24e8   :  { %v2061_v40 = vpop.eup %2060 }
0x24e9   :  { %v1344_v44 = vmul.f32 %v2061_v40, %v1342_v43 }
0x254c   :  { %v1347_v10 = vpop.permute.xlu1 %1346 }
0x254d   :  { %v1349_v42 = vmul.f32 %v2061_v40, %v1347_v10 }
0x254f   :  { %1351 = vrot.lane.b32.xlu0 %v1349_v42, %s2152_s19 }
0x25c1   :  { %v1352_v45 = vpop.permute.xlu0 %1351 }
0x25c2   :  { %v1354_v46 = vadd.f32 %v1352_v45, %v1344_v44 }
0x25c4   :  { %2062 = vtanh.f32 %v1354_v46 }
0x25ce   :  { %v2063_v47 = vpop.eup %2062 }
0x25cf   :  { %1357 = vrot.lane.b32.xlu1 %v2063_v47, %s2152_s19 }
0x2641   :  { %v1358_v48 = vpop.permute.xlu1 %1357 }
0x2642   :  { %v1360_v49 = vmul.f32 %v2061_v40, %v1358_v48 }
0x2644   :  { %v1361_v50 = vpack.c.bf16 %v1360_v49, %v1360_v49 }
0x2646   :  { %v1363_v51 = vrot.slane %v1361_v50, 1 }
0x2648   :  { %1364 = vrot.lane.b32.xlu0 %v1363_v51, %s2153_s21 }
0x26ba   :  { %v1365_v52 = vpop.permute.xlu0 %1364 }
0x26bb   :  { %1905 = vmatmul.mubr.msk.bf16.vlgmr.msra.gmra.mrb[32].mxu0 %vm78_vm1, %v1365_v52 }
0x26bc   :  { %1924 = vmatprep.mubr.msk.f32.mxu0 %vm2151_vm0, %v2150_v1  ;;  %v1421_v1 = vrot.slane %v1354_v46, 6 }
0x278e   :  { %v1403_v53 = vpop.f32.mrb[32].mxu0 }
0x278f   :  { %v1410_v54 = vrot.slane %v1403_v53, 4  ;;  %v1906_v55 = vpop.f32.mrb[33].mxu0 }
0x2790   :  { %v1406_v57 = vpop.f32.mrb[34].mxu0 }
0x2791   :  { %v1412_v58 = vadd.f32 %v1410_v54, %v2462_v41  ;;  %v1907_v59 = vpop.f32.mrb[35].mxu0 }
0x2793   :  { %2064 = vtanh.f32 %v1412_v58  ;;  %v1708_v61 = vmul.f32 -1.442695, %v1412_v58 }
0x2795   :  { %2066 = vpow2.f32 %v1708_v61 }
0x279d   :  { %v2065_v60 = vpop.eup %2064 }
0x279e   :  { %1425 = vrot.lane.b32.xlu1 %v2065_v60, %s2152_s19 }
0x279f   :  { %v2067_v62 = vpop.eup %2066 }
0x27a0   :  { %v1416_v63 = vadd.f32 1.0, %v2067_v62 }
0x27a2   :  { %2068 = vrcp.f32 %v1416_v63 }
0x27ac   :  { %v2069_v0 = vpop.eup %2068 }
0x27ad   :  { %v1423_v6 = vmul.f32 %v2069_v0, %v1421_v1 }
0x2810   :  { %v1426_v37 = vpop.permute.xlu1 %1425 }
0x2811   :  { %v1428_v3 = vmul.f32 %v2069_v0, %v1426_v37 }
0x2813   :  { %1430 = vrot.lane.b32.xlu0 %v1428_v3, %s2152_s19 }
0x2885   :  { %v1431_v7 = vpop.permute.xlu0 %1430 }
0x2886   :  { %v1433_v8 = vadd.f32 %v1431_v7, %v1423_v6 }
0x2888   :  { %2070 = vtanh.f32 %v1433_v8  ;;  %v1500_v26 = vrot.slane %v1433_v8, 6 }
0x2892   :  { %v2071_v9 = vpop.eup %2070 }
0x2893   :  { %1436 = vrot.lane.b32.xlu1 %v2071_v9, %s2152_s19 }
0x2905   :  { %v1437_v16 = vpop.permute.xlu1 %1436 }
0x2906   :  { %v1439_v11 = vmul.f32 %v2069_v0, %v1437_v16 }
0x2908   :  { %v1440_v12 = vpack.c.bf16 %v1439_v11, %v1439_v11 }
0x290a   :  { %v1442_v14 = vrot.slane %v1440_v12, 2 }
0x290c   :  { %1443 = vrot.lane.b32.xlu0 %v1442_v14, %s2153_s21 }
0x297e   :  { %v1444_v34 = vpop.permute.xlu0 %1443 }
0x297f   :  { %1913 = vmatmul.mubr.msk.bf16.vlgmr.msra.gmra.mrb[32].mxu1 %vm78_vm1, %v1444_v34 }
0x2a52   :  { %v1482_v15 = vpop.f32.mrb[32].mxu1 }
0x2a53   :  { %v1489_v20 = vrot.slane %v1482_v15, 2  ;;  %v1914_v5 = vpop.f32.mrb[33].mxu1 }
0x2a54   :  { %v1485_v2 = vpop.f32.mrb[34].mxu1 }
0x2a55   :  { %v1491_v56 = vadd.f32 %v1489_v20, %v2462_v41  ;;  %v1915_v18 = vpop.f32.mrb[35].mxu1  ;;  %v1531_v41 = vld [vmem:[%s2610_s9] sm:$0xff]  ;;  %s2156_s9 = smov [#allocation5]  }
0x2a56   :  { %v1928_v33 = vpack.c.bf16 %v1532_v30, %v1531_v41  ;;  %s1634_s20 = sshll.u32 %s2156_s9, 4  ;;  %s1635_s20 = int_to_ptr.vmem [resolvable:$true] %s1634_s20 }
0x2a57   :  { %2072 = vtanh.f32 %v1491_v56  ;;  %v1710_v4 = vmul.f32 -1.442695, %v1491_v56  ;;  %p2085_p1 = scmp.lt.s32.totalorder %s1635_s20, %s1635_s20 }
0x2a58   :  { %1929 = vmatpush3.bf16.msra.mxu0 %v1928_v33 }
0x2a59   :  { %2074 = vpow2.f32 %v1710_v4  ;;  %1930 = vmatprep.subr.bf16.mxu0 %v2154_v32 }
0x2a5c   :  { %1932 = vmatpush3.bf16.msra.mxu0 %v1931_v36 }
0x2a61   :  { %v2073_v19 = vpop.eup %2072 }
0x2a62   :  { %1504 = vrot.lane.b32.xlu1 %v2073_v19, %s2152_s19 }
0x2a63   :  { %v2075_v21 = vpop.eup %2074 }
0x2a64   :  { %v1495_v22 = vadd.f32 1.0, %v2075_v21 }
0x2a66   :  { %2076 = vrcp.f32 %v1495_v22 }
0x2a70   :  { %v2077_v23 = vpop.eup %2076 }
0x2a71   :  { %v1502_v27 = vmul.f32 %v2077_v23, %v1500_v26 }
0x2ad4   :  { %v1505_v24 = vpop.permute.xlu1 %1504 }
0x2ad5   :  { %v1507_v25 = vmul.f32 %v2077_v23, %v1505_v24 }
0x2ad7   :  { %1509 = vrot.lane.b32.xlu0 %v1507_v25, %s2152_s19 }
0x2b49   :  { %v1510_v28 = vpop.permute.xlu0 %1509 }
0x2b4a   :  { %v1512_v29 = vadd.f32 %v1510_v28, %v1502_v27 }
0x2b4c   :  { %2078 = vtanh.f32 %v1512_v29 }
0x2b56   :  { %v2079_v38 = vpop.eup %2078 }
0x2b57   :  { %1515 = vrot.lane.b32.xlu1 %v2079_v38, %s2152_s19 }
0x2bc9   :  { %v1516_v17 = vpop.permute.xlu1 %1515 }
0x2bca   :  { %v1518_v39 = vmul.f32 %v2077_v23, %v1516_v17 }
0x2bcc   :  { %v1542_v40 = vrot.slane %v1518_v39, 6  ;;  %1520 = vrot.lane.b32.xlu1 %v1518_v39, %s2153_s21 }
0x2bce   :  { %1543 = vrot.lane.b32.xlu0 %v1542_v40, %s2153_s21  ;;  %s2080_s21 = scalar_lea.vmem %s1635_s20, 64 }
0x2bcf   :  { %p2081_p0 = scmp.ne.s32.totalorder %s1635_s20, %s2080_s21  ;;  %p2086_p2 = scmp.lt.s32.totalorder %s2080_s21, %s2080_s21 }
0x2bd0   :  { %1526 = vrot.lane.b32.xlu1 %v1512_v29, %s2155_s5 }
0x2bd1   :  { %p2087_p3 = por %p2086_p2, %p2085_p1 }
0x2bd2   :  { %804 = vrot.lane.b32.xlu0 %v2399_v13, %s2155_s5 }
0x2bd3   :  { %p2088_p4 = pnand %p2087_p3, %p2081_p0 }
0x2c3e   :  { %v1521_v10 = vpop.permute.xlu1 %1520 }
0x2c3f   :  { %1524 = vst.msk [vmem:[#allocation5 - $0x4] sm:$0xc0] %vm469_vm5, %v1521_v10 }
0x2c40   :  { %v1544_v42 = vpop.permute.xlu0 %1543 }
0x2c41   :  { %1925 = vmatmul.mubr.msk.f32.vlgmr.msra.gmra.mrb[36].mxu0 %vm78_vm1, %v1544_v42 }
0x2c42   :  { %v1527_v43 = vpop.permute.xlu1 %1526 }
0x2c43   :  { %1530 = vst.msk [vmem:[#allocation7 - $0x4] sm:$0xc0] %vm469_vm5, %v1527_v43 }
0x2c44   :  { %v805_v44 = vpop.permute.xlu0 %804 }
0x2c45   :  { %807 = vst.msk [vmem:[#allocation7 - $0x6] sm:$0xc0] %vm469_vm5, %v805_v44 }
0x2c46   :  { %2091 = shalt.err (!%p2088_p4)
}
0x2c47   :  { %s2092_s24 = scalar_lea.hbm %s2613_s12, 64 }
0x2c48   :  { %p2093_p5 = scmp.ne.s32.totalorder %s2613_s12, %s2092_s24  ;;  %p2096_p6 = scmp.lt.u32.totalorder %s2092_s24, %s2613_s12 }
0x2c4a   :  { %p2098_p7 = pnand %p2096_p6, %p2093_p5 }
0x2c4c   :  { %2101 = shalt.err (!%p2098_p7)
}
0x2c4d   :  { %s2157_s29 = smov 2   ;;  %s2158_s1 = smov [#allocation7]  }
0x2c4e   :  { %1640 = dma.vmem_to_hbm [thread:$0]  %s1635_s20, 64, %s2613_s12, [#allocation6], %s2152_s19, %s2152_s19, %s2157_s29  }
0x2c4f   :  { %s1646_s6 = sshll.u32 %s2158_s1, 4  ;;  %s1647_s6 = int_to_ptr.vmem [resolvable:$true] %s1646_s6 }
0x2c50   :  { %s2102_s2 = scalar_lea.vmem %s1647_s6, 64  ;;  %p2107_p9 = scmp.lt.s32.totalorder %s1647_s6, %s1647_s6 }
0x2c51   :  { %p2103_p8 = scmp.ne.s32.totalorder %s1647_s6, %s2102_s2  ;;  %p2108_p10 = scmp.lt.s32.totalorder %s2102_s2, %s2102_s2 }
0x2c53   :  { %p2109_p11 = por %p2108_p10, %p2107_p9 }
0x2c55   :  { %p2110_p12 = pnand %p2109_p11, %p2103_p8 }
0x2c57   :  { %2113 = shalt.err (!%p2110_p12)
}
0x2c58   :  { %s2114_s15 = scalar_lea.hbm %s2614_s13, 64 }
0x2c59   :  { %p2115_p13 = scmp.ne.s32.totalorder %s2614_s13, %s2114_s15  ;;  %p2118_p0 = scmp.lt.u32.totalorder %s2114_s15, %s2614_s13 }
0x2c5b   :  { %p2120_p1 = pnand %p2118_p0, %p2115_p13 }
0x2c5d   :  { %2123 = shalt.err (!%p2120_p1)
}
0x2c5e   :  { %1652 = dma.vmem_to_hbm [thread:$0]  %s1647_s6, 64, %s2614_s13, [#allocation6], %s2152_s19, %s2152_s19, %s2157_s29   ;;  %vm1617_vm6 = vcmask 123904  }
0x2c5f   :  { %v1711_v13 = vld [vmem:[%s2611_s10] ss:$0 sm:$0xff]  ;;  %s2159_s9 = smov [#allocation3]  }
0x2c60   :  { %s1625_s20 = sshll.u32 %s2159_s9, 4  ;;  %s1626_s20 = int_to_ptr.vmem [resolvable:$true] %s1625_s20 }
0x2c61   :  { %s2124_s21 = scalar_lea.vmem %s1626_s20, 32  ;;  %p2129_p3 = scmp.lt.s32.totalorder %s1626_s20, %s1626_s20 }
0x2c62   :  { %p2125_p2 = scmp.ne.s32.totalorder %s1626_s20, %s2124_s21  ;;  %p2130_p4 = scmp.lt.s32.totalorder %s2124_s21, %s2124_s21 }
0x2c64   :  { %p2131_p5 = por %p2130_p4, %p2129_p3 }
0x2c66   :  { %p2132_p6 = pnand %p2131_p5, %p2125_p2 }
0x2d14   :  { %v1613_v45 = vpop.f32.mrb[36].mxu0 }
0x2d15   :  { %v1614_v46 = vadd.f32 %v1711_v13, %v1613_v45  ;;  %v1926_v47 = vpop.f32.mrb[37].mxu0 }
0x2d17   :  { %1618 = vst.msk [vmem:[#allocation3] sm:$0x3] %vm1617_vm6, %v1614_v46 }
0x2d18   :  { %2135 = shalt.err (!%p2132_p6)
}
0x2d19   :  { %s2136_s22 = scalar_lea.hbm %s2612_s11, 32 }
0x2d1a   :  { %p2137_p7 = scmp.ne.s32.totalorder %s2612_s11, %s2136_s22  ;;  %p2140_p8 = scmp.lt.u32.totalorder %s2136_s22, %s2612_s11 }
0x2d1c   :  { %p2142_p9 = pnand %p2140_p8, %p2137_p7 }
0x2d1e   :  { %2145 = shalt.err (!%p2142_p9)
}
0x2d1f   :  { %1628 = dma.vmem_to_hbm [thread:$0]  %s1626_s20, 32, %s2612_s11, [#allocation4]  }
0x2d20   :  { %2146 = dma.done.wait [#allocation4], 32  }
0x2d21   :  { %2147 = vsyncadd [#allocation4], 4294967264 }
0x2d22   :  { %2148 = dma.done.wait [#allocation6], 128  }
0x2d23   :  { %2149 = vsyncadd [#allocation6], 4294967168 }
0x2d24   :  { %1662 = vsyncpa [#allocation4], 1 }
0x2d25   :  { %1663 = vsyncpa [#allocation6], 1 }

</bundles_post_ra>
